<compile_context>
chip_gen: v7x
topology: tpu7x:2x2x1
jax: 0.10.0
libtpu: 0.0.40
codegen_flags: <defaults>
</compile_context>

<pallas_src>
import functools
import math

import jax
import jax.numpy as jnp
from jax import lax
from jax.experimental import pallas as pl
from jax.experimental.pallas import tpu as pltpu


def linformer_kernel(x_ref, wq_ref, bq_ref, wk_ref, bk_ref, wv_ref, bv_ref,
                     e_ref, f_ref, wo_ref, bo_ref, out_ref,
                     *, batch_block, seq_len, num_heads, hidden_size, scale):
    """One grid step = one batch block; all heads handled inside."""
    m = batch_block * seq_len
    # (Bb, S, hidden) -> (Bb*S, hidden): fold batch into the matmul M dimension.
    x = x_ref[...].reshape(m, hidden_size).astype(jnp.bfloat16)

    acc = jnp.zeros((m, hidden_size), jnp.float32)

    for h in range(num_heads):
        wq = wq_ref[h]            # (hidden, d) bf16
        wk = wk_ref[h]
        wv = wv_ref[h]
        wo = wo_ref[h]            # (d, hidden) bf16
        e = e_ref[h]              # (S, S) bf16  (k == S: module semantics, see header)
        f = f_ref[h]

        # Per-head projections: bf16 operands, f32 accumulation on the MXU.
        q = jnp.dot(x, wq, preferred_element_type=jnp.float32) + bq_ref[h]
        k = jnp.dot(x, wk, preferred_element_type=jnp.float32) + bk_ref[h]
        v = jnp.dot(x, wv, preferred_element_type=jnp.float32) + bv_ref[h]

        ctxs = []
        # Small static loop over batch elements in the block (row / sublane slices).
        for b in range(batch_block):
            qb = q[b * seq_len:(b + 1) * seq_len].astype(jnp.bfloat16)   # (S, d)
            kb = k[b * seq_len:(b + 1) * seq_len].astype(jnp.bfloat16)
            vb = v[b * seq_len:(b + 1) * seq_len].astype(jnp.bfloat16)

            pk = jnp.dot(e, kb, preferred_element_type=jnp.float32)      # (S, d)
            pv = jnp.dot(f, vb, preferred_element_type=jnp.float32)      # (S, d)

            # scores = qb @ pk^T without materializing the transpose.
            scores = lax.dot_general(
                qb, pk.astype(jnp.bfloat16),
                dimension_numbers=(((1,), (1,)), ((), ())),
                preferred_element_type=jnp.float32) * scale              # (S, S)

            # softmax in f32; denominator on the EUP.
            scores = scores - jnp.max(scores, axis=-1, keepdims=True)
            p = jnp.exp(scores)
            probs = p * pl.reciprocal(jnp.sum(p, axis=-1, keepdims=True),
                                      approx=True)

            ctxs.append(jnp.dot(probs.astype(jnp.bfloat16),
                                pv.astype(jnp.bfloat16),
                                preferred_element_type=jnp.float32))     # (S, d)

        # Row-concatenate (sublane-aligned) and fold this head straight into the
        # output projection: one (m, d) @ (d, hidden) matmul per head.
        ctx_all = ctxs[0] if batch_block == 1 else jnp.concatenate(ctxs, axis=0)
        acc = acc + jnp.dot(ctx_all.astype(jnp.bfloat16), wo,
                            preferred_element_type=jnp.float32)

    out = acc + bo_ref[...]                                              # f32
    out_ref[...] = out.reshape(batch_block, seq_len, hidden_size
                               ).astype(out_ref.dtype)


def _pick_batch_block(batch, seq_len):
    """Largest power-of-two divisor of `batch` keeping Bb*S modest (<= 256 rows)."""
    bb = 1
    while (batch % (bb * 2) == 0) and ((bb * 2) * seq_len <= 256):
        bb *= 2
    return bb


def linformer_attention(hidden_states, params, *, num_heads, batch_block=None):
    """hidden_states: (B, S, hidden) float32. Returns (B, S, hidden)."""
    B, S, hidden = hidden_states.shape
    d = hidden // num_heads
    wq, bq, wk, bk, wv, bv, E, F, wo, bo = params

    if E.shape[-1] != S:
        # The PyTorch forward (E[:, :S, :] @ key_layer) is only shape-valid when
        # k == S; we keep those semantics exactly.
        raise ValueError("reference Linformer semantics require k == seq_len")

    if batch_block is None:
        batch_block = _pick_batch_block(B, S)
    assert B % batch_block == 0

    bf16 = jnp.bfloat16

    def head_major(w):  # (hidden, H*d) -> (H, hidden, d)
        return jnp.transpose(w.reshape(hidden, num_heads, d), (1, 0, 2))

    # Host-side one-time re-layout: head-major weight blocks + bf16 MXU operands.
    wq_h = head_major(wq).astype(bf16)
    wk_h = head_major(wk).astype(bf16)
    wv_h = head_major(wv).astype(bf16)
    wo_h = wo.reshape(num_heads, d, hidden).astype(bf16)
    bq_h = bq.reshape(num_heads, 1, d)      # biases stay f32
    bk_h = bk.reshape(num_heads, 1, d)
    bv_h = bv.reshape(num_heads, 1, d)
    E_s = E[:, :S, :].astype(bf16)          # (H, S, k) with k == S
    F_s = F[:, :S, :].astype(bf16)

    kernel = functools.partial(
        linformer_kernel, batch_block=batch_block, seq_len=S,
        num_heads=num_heads, hidden_size=hidden, scale=1.0 / math.sqrt(d))

    # Batch-blocked input/output; all weights delivered as full (tiny) VMEM blocks.
    x_spec = pl.BlockSpec((batch_block, S, hidden), lambda b: (b, 0, 0))
    w_spec = pl.BlockSpec((num_heads, hidden, d), lambda b: (0, 0, 0))
    b_spec = pl.BlockSpec((num_heads, 1, d), lambda b: (0, 0, 0))
    ef_spec = pl.BlockSpec((num_heads, S, S), lambda b: (0, 0, 0))
    wo_spec = pl.BlockSpec((num_heads, d, hidden), lambda b: (0, 0, 0))
    bo_spec = pl.BlockSpec((1, hidden), lambda b: (0, 0))

    return pl.pallas_call(
        kernel,
        out_shape=jax.ShapeDtypeStruct((B, S, hidden), hidden_states.dtype),
        grid_spec=pltpu.PrefetchScalarGridSpec(
            num_scalar_prefetch=0,
            grid=(B // batch_block,),
            in_specs=[x_spec,
                      w_spec, b_spec,       # Wq, bq  (head-major)
                      w_spec, b_spec,       # Wk, bk
                      w_spec, b_spec,       # Wv, bv
                      ef_spec, ef_spec,     # E, F    (per-head blocks)
                      wo_spec, bo_spec],    # Wo (head rows), bo
            out_specs=x_spec),
        compiler_params=pltpu.CompilerParams(
            dimension_semantics=("parallel",),
            vmem_limit_bytes=32 * 1024 * 1024),
    )(hidden_states, wq_h, bq_h, wk_h, bk_h, wv_h, bv_h, E_s, F_s, wo_h, bo)


def reference_jax(hidden_states, params, *, num_heads):
    """Pure-JAX (f32) re-implementation of the PyTorch forward, for validation."""
    wq, bq, wk, bk, wv, bv, E, F, wo, bo = params
    B, S, hidden = hidden_states.shape
    d = hidden // num_heads

    def split_heads(x):  # (B,S,hidden) -> (B,H,S,d)
        return x.reshape(B, S, num_heads, d).transpose(0, 2, 1, 3)

    q = split_heads(hidden_states @ wq + bq[0])
    k = split_heads(hidden_states @ wk + bk[0])
    v = split_heads(hidden_states @ wv + bv[0])

    E_s = E[:, :S, :][None]            # (1,H,S,k)
    F_s = F[:, :S, :][None]
    pk = jnp.einsum('xhsk,bhkd->bhsd', E_s, k)   # matches torch.matmul(E, key)
    pv = jnp.einsum('xhsk,bhkd->bhsd', F_s, v)
    scores = jnp.einsum('bhqd,bhkd->bhqk', q, pk) / math.sqrt(d)
    probs = jax.nn.softmax(scores, axis=-1)
    ctx = jnp.einsum('bhqk,bhkd->bhqd', probs, pv)
    ctx = ctx.transpose(0, 2, 1, 3).reshape(B, S, hidden)
    return ctx @ wo + bo[0]


def make_params(key, hidden, num_heads, max_seq_length, k_ratio):
    """Deterministic parameter init (synthetic, xavier-uniform style), f32."""
    kdim = max(1, int(max_seq_length * k_ratio))
    keys = jax.random.split(key, 10)

    def xavier(key, shape, fan_in, fan_out):
        bound = math.sqrt(6.0 / (fan_in + fan_out))
        return jax.random.uniform(key, shape, jnp.float32, -bound, bound)

    wq = xavier(keys[0], (hidden, hidden), hidden, hidden)
    wk = xavier(keys[1], (hidden, hidden), hidden, hidden)
    wv = xavier(keys[2], (hidden, hidden), hidden, hidden)
    wo = xavier(keys[3], (hidden, hidden), hidden, hidden)
    bq = xavier(keys[4], (1, hidden), hidden, hidden)
    bk = xavier(keys[5], (1, hidden), hidden, hidden)
    bv = xavier(keys[6], (1, hidden), hidden, hidden)
    bo = xavier(keys[7], (1, hidden), hidden, hidden)
    E = xavier(keys[8], (num_heads, max_seq_length, kdim),
               max_seq_length * kdim, num_heads * kdim)
    F = xavier(keys[9], (num_heads, max_seq_length, kdim),
               max_seq_length * kdim, num_heads * kdim)
    return (wq, bq, wk, bk, wv, bv, E, F, wo, bo)


if __name__ == "__main__":
    # Small shapes consistent with the module.  seq_len == k so that the reference
    # code's matmul (E[:, :seq_len] @ key_layer) is shape-valid.
    batch = 2
    hidden = 32
    num_heads = 4
    max_seq_length = 32
    k_ratio = 0.25          # -> k = 8
    seq_len = 8             # == k

    key = jax.random.PRNGKey(0)
    k_x, k_p = jax.random.split(key)
    x = jax.random.normal(k_x, (batch, seq_len, hidden), jnp.float32)
    params = make_params(k_p, hidden, num_heads, max_seq_length, k_ratio)

    out = linformer_attention(x, params, num_heads=num_heads)
    out = jax.block_until_ready(out)

    ref = reference_jax(x, params, num_heads=num_heads)
    assert out.shape == (batch, seq_len, hidden)
    # bf16 MXU operands + approx reciprocal vs f32 reference -> loosened tolerance.
    assert jnp.allclose(out, ref, atol=5e-2, rtol=5e-2), (
        "kernel mismatch vs reference; max abs err = "
        f"{float(jnp.max(jnp.abs(out - ref)))}")

    print("KERNEL_OK")
</pallas_src>

<mosaic_0001>
module attributes {stable_mosaic.version = 11 : i64} {
  func.func @linformer_kernel(%arg0: i32, %arg1: memref<2x8x32xf32, #tpu.memory_space<vmem>>, %arg2: memref<4x32x8xbf16, #tpu.memory_space<vmem>>, %arg3: memref<4x1x8xf32, #tpu.memory_space<vmem>>, %arg4: memref<4x32x8xbf16, #tpu.memory_space<vmem>>, %arg5: memref<4x1x8xf32, #tpu.memory_space<vmem>>, %arg6: memref<4x32x8xbf16, #tpu.memory_space<vmem>>, %arg7: memref<4x1x8xf32, #tpu.memory_space<vmem>>, %arg8: memref<4x8x8xbf16, #tpu.memory_space<vmem>>, %arg9: memref<4x8x8xbf16, #tpu.memory_space<vmem>>, %arg10: memref<4x8x32xbf16, #tpu.memory_space<vmem>>, %arg11: memref<1x32xf32, #tpu.memory_space<vmem>>, %arg12: memref<2x8x32xf32, #tpu.memory_space<vmem>>) attributes {dimension_semantics = [#tpu.dimension_semantics<parallel>], iteration_bounds = array<i64: 1>, scalar_prefetch = 0 : i64, scratch_operands = 0 : i64, tpu.core_type = #tpu.core_type<tc>, window_params = [{transform_indices = @transform_0, window_bounds = array<i64: 2, 8, 32>}, {pipeline_mode = #tpu.pipeline_mode<synchronous>, transform_indices = @transform_1, window_bounds = array<i64: 4, 32, 8>}, {pipeline_mode = #tpu.pipeline_mode<synchronous>, transform_indices = @transform_2, window_bounds = array<i64: 4, 1, 8>}, {pipeline_mode = #tpu.pipeline_mode<synchronous>, transform_indices = @transform_3, window_bounds = array<i64: 4, 32, 8>}, {pipeline_mode = #tpu.pipeline_mode<synchronous>, transform_indices = @transform_4, window_bounds = array<i64: 4, 1, 8>}, {pipeline_mode = #tpu.pipeline_mode<synchronous>, transform_indices = @transform_5, window_bounds = array<i64: 4, 32, 8>}, {pipeline_mode = #tpu.pipeline_mode<synchronous>, transform_indices = @transform_6, window_bounds = array<i64: 4, 1, 8>}, {pipeline_mode = #tpu.pipeline_mode<synchronous>, transform_indices = @transform_7, window_bounds = array<i64: 4, 8, 8>}, {pipeline_mode = #tpu.pipeline_mode<synchronous>, transform_indices = @transform_8, window_bounds = array<i64: 4, 8, 8>}, {pipeline_mode = #tpu.pipeline_mode<synchronous>, transform_indices = @transform_9, window_bounds = array<i64: 4, 8, 32>}, {pipeline_mode = #tpu.pipeline_mode<synchronous>, transform_indices = @transform_10, window_bounds = array<i64: 1, 32>}, {transform_indices = @transform_11, window_bounds = array<i64: 2, 8, 32>}]} {
    %c0 = arith.constant 0 : index
    %c0_0 = arith.constant 0 : index
    %c0_1 = arith.constant 0 : index
    %0 = vector.load %arg1[%c0, %c0_0, %c0_1] : memref<2x8x32xf32, #tpu.memory_space<vmem>>, vector<2x8x32xf32>
    %1 = vector.shape_cast %0 : vector<2x8x32xf32> to vector<16x32xf32>
    %2 = arith.truncf %1 : vector<16x32xf32> to vector<16x32xbf16>
    %cst = arith.constant 0.000000e+00 : f32
    %3 = vector.broadcast %cst : f32 to vector<16x32xf32>
    %c0_2 = arith.constant 0 : index
    %c0_3 = arith.constant 0 : index
    %c0_4 = arith.constant 0 : index
    %4 = vector.load %arg2[%c0_2, %c0_3, %c0_4] : memref<4x32x8xbf16, #tpu.memory_space<vmem>>, vector<1x32x8xbf16>
    %5 = vector.shape_cast %4 : vector<1x32x8xbf16> to vector<32x8xbf16>
    %c0_5 = arith.constant 0 : index
    %c0_6 = arith.constant 0 : index
    %c0_7 = arith.constant 0 : index
    %6 = vector.load %arg4[%c0_5, %c0_6, %c0_7] : memref<4x32x8xbf16, #tpu.memory_space<vmem>>, vector<1x32x8xbf16>
    %7 = vector.shape_cast %6 : vector<1x32x8xbf16> to vector<32x8xbf16>
    %c0_8 = arith.constant 0 : index
    %c0_9 = arith.constant 0 : index
    %c0_10 = arith.constant 0 : index
    %8 = vector.load %arg6[%c0_8, %c0_9, %c0_10] : memref<4x32x8xbf16, #tpu.memory_space<vmem>>, vector<1x32x8xbf16>
    %9 = vector.shape_cast %8 : vector<1x32x8xbf16> to vector<32x8xbf16>
    %c0_11 = arith.constant 0 : index
    %c0_12 = arith.constant 0 : index
    %c0_13 = arith.constant 0 : index
    %10 = vector.load %arg10[%c0_11, %c0_12, %c0_13] : memref<4x8x32xbf16, #tpu.memory_space<vmem>>, vector<1x8x32xbf16>
    %11 = vector.shape_cast %10 : vector<1x8x32xbf16> to vector<8x32xbf16>
    %c0_14 = arith.constant 0 : index
    %c0_15 = arith.constant 0 : index
    %c0_16 = arith.constant 0 : index
    %12 = vector.load %arg8[%c0_14, %c0_15, %c0_16] : memref<4x8x8xbf16, #tpu.memory_space<vmem>>, vector<1x8x8xbf16>
    %13 = vector.shape_cast %12 : vector<1x8x8xbf16> to vector<8x8xbf16>
    %c0_17 = arith.constant 0 : index
    %c0_18 = arith.constant 0 : index
    %c0_19 = arith.constant 0 : index
    %14 = vector.load %arg9[%c0_17, %c0_18, %c0_19] : memref<4x8x8xbf16, #tpu.memory_space<vmem>>, vector<1x8x8xbf16>
    %15 = vector.shape_cast %14 : vector<1x8x8xbf16> to vector<8x8xbf16>
    %cst_20 = arith.constant dense<0.000000e+00> : vector<16x8xf32>
    %16 = tpu.matmul %2, %5, %cst_20 {dimension_numbers = #tpu.dot_dimension_numbers<[1], [0], [0], [1], [0, 0, 1, 1], [], []>} : vector<16x32xbf16>, vector<32x8xbf16>, vector<16x8xf32> -> vector<16x8xf32>
    %c0_21 = arith.constant 0 : index
    %c0_22 = arith.constant 0 : index
    %c0_23 = arith.constant 0 : index
    %17 = vector.load %arg3[%c0_21, %c0_22, %c0_23] : memref<4x1x8xf32, #tpu.memory_space<vmem>>, vector<1x1x8xf32>
    %18 = vector.shape_cast %17 : vector<1x1x8xf32> to vector<1x8xf32>
    %19 = vector.broadcast %18 : vector<1x8xf32> to vector<16x8xf32>
    %20 = arith.addf %16, %19 : vector<16x8xf32>
    %cst_24 = arith.constant dense<0.000000e+00> : vector<16x8xf32>
    %21 = tpu.matmul %2, %7, %cst_24 {dimension_numbers = #tpu.dot_dimension_numbers<[1], [0], [0], [1], [0, 0, 1, 1], [], []>} : vector<16x32xbf16>, vector<32x8xbf16>, vector<16x8xf32> -> vector<16x8xf32>
    %c0_25 = arith.constant 0 : index
    %c0_26 = arith.constant 0 : index
    %c0_27 = arith.constant 0 : index
    %22 = vector.load %arg5[%c0_25, %c0_26, %c0_27] : memref<4x1x8xf32, #tpu.memory_space<vmem>>, vector<1x1x8xf32>
    %23 = vector.shape_cast %22 : vector<1x1x8xf32> to vector<1x8xf32>
    %24 = vector.broadcast %23 : vector<1x8xf32> to vector<16x8xf32>
    %25 = arith.addf %21, %24 : vector<16x8xf32>
    %cst_28 = arith.constant dense<0.000000e+00> : vector<16x8xf32>
    %26 = tpu.matmul %2, %9, %cst_28 {dimension_numbers = #tpu.dot_dimension_numbers<[1], [0], [0], [1], [0, 0, 1, 1], [], []>} : vector<16x32xbf16>, vector<32x8xbf16>, vector<16x8xf32> -> vector<16x8xf32>
    %c0_29 = arith.constant 0 : index
    %c0_30 = arith.constant 0 : index
    %c0_31 = arith.constant 0 : index
    %27 = vector.load %arg7[%c0_29, %c0_30, %c0_31] : memref<4x1x8xf32, #tpu.memory_space<vmem>>, vector<1x1x8xf32>
    %28 = vector.shape_cast %27 : vector<1x1x8xf32> to vector<1x8xf32>
    %29 = vector.broadcast %28 : vector<1x8xf32> to vector<16x8xf32>
    %30 = arith.addf %26, %29 : vector<16x8xf32>
    %31 = vector.extract_strided_slice %20 {offsets = [0, 0], sizes = [8, 8], strides = [1, 1]} : vector<16x8xf32> to vector<8x8xf32>
    %32 = arith.truncf %31 : vector<8x8xf32> to vector<8x8xbf16>
    %33 = vector.extract_strided_slice %25 {offsets = [0, 0], sizes = [8, 8], strides = [1, 1]} : vector<16x8xf32> to vector<8x8xf32>
    %34 = arith.truncf %33 : vector<8x8xf32> to vector<8x8xbf16>
    %35 = vector.extract_strided_slice %30 {offsets = [0, 0], sizes = [8, 8], strides = [1, 1]} : vector<16x8xf32> to vector<8x8xf32>
    %36 = arith.truncf %35 : vector<8x8xf32> to vector<8x8xbf16>
    %cst_32 = arith.constant dense<0.000000e+00> : vector<8x8xf32>
    %37 = tpu.matmul %13, %34, %cst_32 {dimension_numbers = #tpu.dot_dimension_numbers<[1], [0], [0], [1], [0, 0, 1, 1], [], []>} : vector<8x8xbf16>, vector<8x8xbf16>, vector<8x8xf32> -> vector<8x8xf32>
    %cst_33 = arith.constant dense<0.000000e+00> : vector<8x8xf32>
    %38 = tpu.matmul %15, %36, %cst_33 {dimension_numbers = #tpu.dot_dimension_numbers<[1], [0], [0], [1], [0, 0, 1, 1], [], []>} : vector<8x8xbf16>, vector<8x8xbf16>, vector<8x8xf32> -> vector<8x8xf32>
    %39 = arith.truncf %37 : vector<8x8xf32> to vector<8x8xbf16>
    %cst_34 = arith.constant dense<0.000000e+00> : vector<8x8xf32>
    %40 = tpu.matmul %32, %39, %cst_34 {dimension_numbers = #tpu.dot_dimension_numbers<[1], [1], [0], [0], [0, 0, 1, 0], [], []>} : vector<8x8xbf16>, vector<8x8xbf16>, vector<8x8xf32> -> vector<8x8xf32>
    %cst_35 = arith.constant 0.353553385 : f32
    %41 = vector.broadcast %cst_35 : f32 to vector<8x8xf32>
    %42 = arith.mulf %40, %41 : vector<8x8xf32>
    %cst_36 = arith.constant dense<0xFF800000> : vector<8xf32>
    %43 = vector.multi_reduction <maximumf>, %42, %cst_36 [1] : vector<8x8xf32> to vector<8xf32>
    %44 = vector.shape_cast %43 : vector<8xf32> to vector<8x1xf32>
    %45 = vector.broadcast %44 : vector<8x1xf32> to vector<8x8xf32>
    %46 = arith.subf %42, %45 : vector<8x8xf32>
    %47 = math.exp %46 : vector<8x8xf32>
    %cst_37 = arith.constant dense<0.000000e+00> : vector<8xf32>
    %48 = vector.multi_reduction <add>, %47, %cst_37 [1] : vector<8x8xf32> to vector<8xf32>
    %49 = vector.shape_cast %48 : vector<8xf32> to vector<8x1xf32>
    %50 = tpu.reciprocal %49 {approx = true} : vector<8x1xf32> -> vector<8x1xf32>
    %51 = vector.broadcast %50 : vector<8x1xf32> to vector<8x8xf32>
    %52 = arith.mulf %47, %51 : vector<8x8xf32>
    %53 = arith.truncf %52 : vector<8x8xf32> to vector<8x8xbf16>
    %54 = arith.truncf %38 : vector<8x8xf32> to vector<8x8xbf16>
    %cst_38 = arith.constant dense<0.000000e+00> : vector<8x8xf32>
    %55 = tpu.matmul %53, %54, %cst_38 {dimension_numbers = #tpu.dot_dimension_numbers<[1], [0], [0], [1], [0, 0, 1, 1], [], []>} : vector<8x8xbf16>, vector<8x8xbf16>, vector<8x8xf32> -> vector<8x8xf32>
    %56 = vector.extract_strided_slice %20 {offsets = [8, 0], sizes = [8, 8], strides = [1, 1]} : vector<16x8xf32> to vector<8x8xf32>
    %57 = arith.truncf %56 : vector<8x8xf32> to vector<8x8xbf16>
    %58 = vector.extract_strided_slice %25 {offsets = [8, 0], sizes = [8, 8], strides = [1, 1]} : vector<16x8xf32> to vector<8x8xf32>
    %59 = arith.truncf %58 : vector<8x8xf32> to vector<8x8xbf16>
    %60 = vector.extract_strided_slice %30 {offsets = [8, 0], sizes = [8, 8], strides = [1, 1]} : vector<16x8xf32> to vector<8x8xf32>
    %61 = arith.truncf %60 : vector<8x8xf32> to vector<8x8xbf16>
    %cst_39 = arith.constant dense<0.000000e+00> : vector<8x8xf32>
    %62 = tpu.matmul %13, %59, %cst_39 {dimension_numbers = #tpu.dot_dimension_numbers<[1], [0], [0], [1], [0, 0, 1, 1], [], []>} : vector<8x8xbf16>, vector<8x8xbf16>, vector<8x8xf32> -> vector<8x8xf32>
    %cst_40 = arith.constant dense<0.000000e+00> : vector<8x8xf32>
    %63 = tpu.matmul %15, %61, %cst_40 {dimension_numbers = #tpu.dot_dimension_numbers<[1], [0], [0], [1], [0, 0, 1, 1], [], []>} : vector<8x8xbf16>, vector<8x8xbf16>, vector<8x8xf32> -> vector<8x8xf32>
    %64 = arith.truncf %62 : vector<8x8xf32> to vector<8x8xbf16>
    %cst_41 = arith.constant dense<0.000000e+00> : vector<8x8xf32>
    %65 = tpu.matmul %57, %64, %cst_41 {dimension_numbers = #tpu.dot_dimension_numbers<[1], [1], [0], [0], [0, 0, 1, 0], [], []>} : vector<8x8xbf16>, vector<8x8xbf16>, vector<8x8xf32> -> vector<8x8xf32>
    %cst_42 = arith.constant 0.353553385 : f32
    %66 = vector.broadcast %cst_42 : f32 to vector<8x8xf32>
    %67 = arith.mulf %65, %66 : vector<8x8xf32>
    %cst_43 = arith.constant dense<0xFF800000> : vector<8xf32>
    %68 = vector.multi_reduction <maximumf>, %67, %cst_43 [1] : vector<8x8xf32> to vector<8xf32>
    %69 = vector.shape_cast %68 : vector<8xf32> to vector<8x1xf32>
    %70 = vector.broadcast %69 : vector<8x1xf32> to vector<8x8xf32>
    %71 = arith.subf %67, %70 : vector<8x8xf32>
    %72 = math.exp %71 : vector<8x8xf32>
    %cst_44 = arith.constant dense<0.000000e+00> : vector<8xf32>
    %73 = vector.multi_reduction <add>, %72, %cst_44 [1] : vector<8x8xf32> to vector<8xf32>
    %74 = vector.shape_cast %73 : vector<8xf32> to vector<8x1xf32>
    %75 = tpu.reciprocal %74 {approx = true} : vector<8x1xf32> -> vector<8x1xf32>
    %76 = vector.broadcast %75 : vector<8x1xf32> to vector<8x8xf32>
    %77 = arith.mulf %72, %76 : vector<8x8xf32>
    %78 = arith.truncf %77 : vector<8x8xf32> to vector<8x8xbf16>
    %79 = arith.truncf %63 : vector<8x8xf32> to vector<8x8xbf16>
    %cst_45 = arith.constant dense<0.000000e+00> : vector<8x8xf32>
    %80 = tpu.matmul %78, %79, %cst_45 {dimension_numbers = #tpu.dot_dimension_numbers<[1], [0], [0], [1], [0, 0, 1, 1], [], []>} : vector<8x8xbf16>, vector<8x8xbf16>, vector<8x8xf32> -> vector<8x8xf32>
    %81 = tpu.concatenate %55, %80 in 0 : vector<8x8xf32>, vector<8x8xf32> -> vector<16x8xf32>
    %82 = arith.truncf %81 : vector<16x8xf32> to vector<16x8xbf16>
    %cst_46 = arith.constant dense<0.000000e+00> : vector<16x32xf32>
    %83 = tpu.matmul %82, %11, %cst_46 {dimension_numbers = #tpu.dot_dimension_numbers<[1], [0], [0], [1], [0, 0, 1, 1], [], []>} : vector<16x8xbf16>, vector<8x32xbf16>, vector<16x32xf32> -> vector<16x32xf32>
    %84 = arith.addf %3, %83 : vector<16x32xf32>
    %c1 = arith.constant 1 : index
    %c0_47 = arith.constant 0 : index
    %c0_48 = arith.constant 0 : index
    %85 = vector.load %arg2[%c1, %c0_47, %c0_48] : memref<4x32x8xbf16, #tpu.memory_space<vmem>>, vector<1x32x8xbf16>
    %86 = vector.shape_cast %85 : vector<1x32x8xbf16> to vector<32x8xbf16>
    %c1_49 = arith.constant 1 : index
    %c0_50 = arith.constant 0 : index
    %c0_51 = arith.constant 0 : index
    %87 = vector.load %arg4[%c1_49, %c0_50, %c0_51] : memref<4x32x8xbf16, #tpu.memory_space<vmem>>, vector<1x32x8xbf16>
    %88 = vector.shape_cast %87 : vector<1x32x8xbf16> to vector<32x8xbf16>
    %c1_52 = arith.constant 1 : index
    %c0_53 = arith.constant 0 : index
    %c0_54 = arith.constant 0 : index
    %89 = vector.load %arg6[%c1_52, %c0_53, %c0_54] : memref<4x32x8xbf16, #tpu.memory_space<vmem>>, vector<1x32x8xbf16>
    %90 = vector.shape_cast %89 : vector<1x32x8xbf16> to vector<32x8xbf16>
    %c1_55 = arith.constant 1 : index
    %c0_56 = arith.constant 0 : index
    %c0_57 = arith.constant 0 : index
    %91 = vector.load %arg10[%c1_55, %c0_56, %c0_57] : memref<4x8x32xbf16, #tpu.memory_space<vmem>>, vector<1x8x32xbf16>
    %92 = vector.shape_cast %91 : vector<1x8x32xbf16> to vector<8x32xbf16>
    %c1_58 = arith.constant 1 : index
    %c0_59 = arith.constant 0 : index
    %c0_60 = arith.constant 0 : index
    %93 = vector.load %arg8[%c1_58, %c0_59, %c0_60] : memref<4x8x8xbf16, #tpu.memory_space<vmem>>, vector<1x8x8xbf16>
    %94 = vector.shape_cast %93 : vector<1x8x8xbf16> to vector<8x8xbf16>
    %c1_61 = arith.constant 1 : index
    %c0_62 = arith.constant 0 : index
    %c0_63 = arith.constant 0 : index
    %95 = vector.load %arg9[%c1_61, %c0_62, %c0_63] : memref<4x8x8xbf16, #tpu.memory_space<vmem>>, vector<1x8x8xbf16>
    %96 = vector.shape_cast %95 : vector<1x8x8xbf16> to vector<8x8xbf16>
    %cst_64 = arith.constant dense<0.000000e+00> : vector<16x8xf32>
    %97 = tpu.matmul %2, %86, %cst_64 {dimension_numbers = #tpu.dot_dimension_numbers<[1], [0], [0], [1], [0, 0, 1, 1], [], []>} : vector<16x32xbf16>, vector<32x8xbf16>, vector<16x8xf32> -> vector<16x8xf32>
    %c1_65 = arith.constant 1 : index
    %c0_66 = arith.constant 0 : index
    %c0_67 = arith.constant 0 : index
    %98 = vector.load %arg3[%c1_65, %c0_66, %c0_67] : memref<4x1x8xf32, #tpu.memory_space<vmem>>, vector<1x1x8xf32>
    %99 = vector.shape_cast %98 : vector<1x1x8xf32> to vector<1x8xf32>
    %100 = vector.broadcast %99 : vector<1x8xf32> to vector<16x8xf32>
    %101 = arith.addf %97, %100 : vector<16x8xf32>
    %cst_68 = arith.constant dense<0.000000e+00> : vector<16x8xf32>
    %102 = tpu.matmul %2, %88, %cst_68 {dimension_numbers = #tpu.dot_dimension_numbers<[1], [0], [0], [1], [0, 0, 1, 1], [], []>} : vector<16x32xbf16>, vector<32x8xbf16>, vector<16x8xf32> -> vector<16x8xf32>
    %c1_69 = arith.constant 1 : index
    %c0_70 = arith.constant 0 : index
    %c0_71 = arith.constant 0 : index
    %103 = vector.load %arg5[%c1_69, %c0_70, %c0_71] : memref<4x1x8xf32, #tpu.memory_space<vmem>>, vector<1x1x8xf32>
    %104 = vector.shape_cast %103 : vector<1x1x8xf32> to vector<1x8xf32>
    %105 = vector.broadcast %104 : vector<1x8xf32> to vector<16x8xf32>
    %106 = arith.addf %102, %105 : vector<16x8xf32>
    %cst_72 = arith.constant dense<0.000000e+00> : vector<16x8xf32>
    %107 = tpu.matmul %2, %90, %cst_72 {dimension_numbers = #tpu.dot_dimension_numbers<[1], [0], [0], [1], [0, 0, 1, 1], [], []>} : vector<16x32xbf16>, vector<32x8xbf16>, vector<16x8xf32> -> vector<16x8xf32>
    %c1_73 = arith.constant 1 : index
    %c0_74 = arith.constant 0 : index
    %c0_75 = arith.constant 0 : index
    %108 = vector.load %arg7[%c1_73, %c0_74, %c0_75] : memref<4x1x8xf32, #tpu.memory_space<vmem>>, vector<1x1x8xf32>
    %109 = vector.shape_cast %108 : vector<1x1x8xf32> to vector<1x8xf32>
    %110 = vector.broadcast %109 : vector<1x8xf32> to vector<16x8xf32>
    %111 = arith.addf %107, %110 : vector<16x8xf32>
    %112 = vector.extract_strided_slice %101 {offsets = [0, 0], sizes = [8, 8], strides = [1, 1]} : vector<16x8xf32> to vector<8x8xf32>
    %113 = arith.truncf %112 : vector<8x8xf32> to vector<8x8xbf16>
    %114 = vector.extract_strided_slice %106 {offsets = [0, 0], sizes = [8, 8], strides = [1, 1]} : vector<16x8xf32> to vector<8x8xf32>
    %115 = arith.truncf %114 : vector<8x8xf32> to vector<8x8xbf16>
    %116 = vector.extract_strided_slice %111 {offsets = [0, 0], sizes = [8, 8], strides = [1, 1]} : vector<16x8xf32> to vector<8x8xf32>
    %117 = arith.truncf %116 : vector<8x8xf32> to vector<8x8xbf16>
    %cst_76 = arith.constant dense<0.000000e+00> : vector<8x8xf32>
    %118 = tpu.matmul %94, %115, %cst_76 {dimension_numbers = #tpu.dot_dimension_numbers<[1], [0], [0], [1], [0, 0, 1, 1], [], []>} : vector<8x8xbf16>, vector<8x8xbf16>, vector<8x8xf32> -> vector<8x8xf32>
    %cst_77 = arith.constant dense<0.000000e+00> : vector<8x8xf32>
    %119 = tpu.matmul %96, %117, %cst_77 {dimension_numbers = #tpu.dot_dimension_numbers<[1], [0], [0], [1], [0, 0, 1, 1], [], []>} : vector<8x8xbf16>, vector<8x8xbf16>, vector<8x8xf32> -> vector<8x8xf32>
    %120 = arith.truncf %118 : vector<8x8xf32> to vector<8x8xbf16>
    %cst_78 = arith.constant dense<0.000000e+00> : vector<8x8xf32>
    %121 = tpu.matmul %113, %120, %cst_78 {dimension_numbers = #tpu.dot_dimension_numbers<[1], [1], [0], [0], [0, 0, 1, 0], [], []>} : vector<8x8xbf16>, vector<8x8xbf16>, vector<8x8xf32> -> vector<8x8xf32>
    %cst_79 = arith.constant 0.353553385 : f32
    %122 = vector.broadcast %cst_79 : f32 to vector<8x8xf32>
    %123 = arith.mulf %121, %122 : vector<8x8xf32>
    %cst_80 = arith.constant dense<0xFF800000> : vector<8xf32>
    %124 = vector.multi_reduction <maximumf>, %123, %cst_80 [1] : vector<8x8xf32> to vector<8xf32>
    %125 = vector.shape_cast %124 : vector<8xf32> to vector<8x1xf32>
    %126 = vector.broadcast %125 : vector<8x1xf32> to vector<8x8xf32>
    %127 = arith.subf %123, %126 : vector<8x8xf32>
    %128 = math.exp %127 : vector<8x8xf32>
    %cst_81 = arith.constant dense<0.000000e+00> : vector<8xf32>
    %129 = vector.multi_reduction <add>, %128, %cst_81 [1] : vector<8x8xf32> to vector<8xf32>
    %130 = vector.shape_cast %129 : vector<8xf32> to vector<8x1xf32>
    %131 = tpu.reciprocal %130 {approx = true} : vector<8x1xf32> -> vector<8x1xf32>
    %132 = vector.broadcast %131 : vector<8x1xf32> to vector<8x8xf32>
    %133 = arith.mulf %128, %132 : vector<8x8xf32>
    %134 = arith.truncf %133 : vector<8x8xf32> to vector<8x8xbf16>
    %135 = arith.truncf %119 : vector<8x8xf32> to vector<8x8xbf16>
    %cst_82 = arith.constant dense<0.000000e+00> : vector<8x8xf32>
    %136 = tpu.matmul %134, %135, %cst_82 {dimension_numbers = #tpu.dot_dimension_numbers<[1], [0], [0], [1], [0, 0, 1, 1], [], []>} : vector<8x8xbf16>, vector<8x8xbf16>, vector<8x8xf32> -> vector<8x8xf32>
    %137 = vector.extract_strided_slice %101 {offsets = [8, 0], sizes = [8, 8], strides = [1, 1]} : vector<16x8xf32> to vector<8x8xf32>
    %138 = arith.truncf %137 : vector<8x8xf32> to vector<8x8xbf16>
    %139 = vector.extract_strided_slice %106 {offsets = [8, 0], sizes = [8, 8], strides = [1, 1]} : vector<16x8xf32> to vector<8x8xf32>
    %140 = arith.truncf %139 : vector<8x8xf32> to vector<8x8xbf16>
    %141 = vector.extract_strided_slice %111 {offsets = [8, 0], sizes = [8, 8], strides = [1, 1]} : vector<16x8xf32> to vector<8x8xf32>
    %142 = arith.truncf %141 : vector<8x8xf32> to vector<8x8xbf16>
    %cst_83 = arith.constant dense<0.000000e+00> : vector<8x8xf32>
    %143 = tpu.matmul %94, %140, %cst_83 {dimension_numbers = #tpu.dot_dimension_numbers<[1], [0], [0], [1], [0, 0, 1, 1], [], []>} : vector<8x8xbf16>, vector<8x8xbf16>, vector<8x8xf32> -> vector<8x8xf32>
    %cst_84 = arith.constant dense<0.000000e+00> : vector<8x8xf32>
    %144 = tpu.matmul %96, %142, %cst_84 {dimension_numbers = #tpu.dot_dimension_numbers<[1], [0], [0], [1], [0, 0, 1, 1], [], []>} : vector<8x8xbf16>, vector<8x8xbf16>, vector<8x8xf32> -> vector<8x8xf32>
    %145 = arith.truncf %143 : vector<8x8xf32> to vector<8x8xbf16>
    %cst_85 = arith.constant dense<0.000000e+00> : vector<8x8xf32>
    %146 = tpu.matmul %138, %145, %cst_85 {dimension_numbers = #tpu.dot_dimension_numbers<[1], [1], [0], [0], [0, 0, 1, 0], [], []>} : vector<8x8xbf16>, vector<8x8xbf16>, vector<8x8xf32> -> vector<8x8xf32>
    %cst_86 = arith.constant 0.353553385 : f32
    %147 = vector.broadcast %cst_86 : f32 to vector<8x8xf32>
    %148 = arith.mulf %146, %147 : vector<8x8xf32>
    %cst_87 = arith.constant dense<0xFF800000> : vector<8xf32>
    %149 = vector.multi_reduction <maximumf>, %148, %cst_87 [1] : vector<8x8xf32> to vector<8xf32>
    %150 = vector.shape_cast %149 : vector<8xf32> to vector<8x1xf32>
    %151 = vector.broadcast %150 : vector<8x1xf32> to vector<8x8xf32>
    %152 = arith.subf %148, %151 : vector<8x8xf32>
    %153 = math.exp %152 : vector<8x8xf32>
    %cst_88 = arith.constant dense<0.000000e+00> : vector<8xf32>
    %154 = vector.multi_reduction <add>, %153, %cst_88 [1] : vector<8x8xf32> to vector<8xf32>
    %155 = vector.shape_cast %154 : vector<8xf32> to vector<8x1xf32>
    %156 = tpu.reciprocal %155 {approx = true} : vector<8x1xf32> -> vector<8x1xf32>
    %157 = vector.broadcast %156 : vector<8x1xf32> to vector<8x8xf32>
    %158 = arith.mulf %153, %157 : vector<8x8xf32>
    %159 = arith.truncf %158 : vector<8x8xf32> to vector<8x8xbf16>
    %160 = arith.truncf %144 : vector<8x8xf32> to vector<8x8xbf16>
    %cst_89 = arith.constant dense<0.000000e+00> : vector<8x8xf32>
    %161 = tpu.matmul %159, %160, %cst_89 {dimension_numbers = #tpu.dot_dimension_numbers<[1], [0], [0], [1], [0, 0, 1, 1], [], []>} : vector<8x8xbf16>, vector<8x8xbf16>, vector<8x8xf32> -> vector<8x8xf32>
    %162 = tpu.concatenate %136, %161 in 0 : vector<8x8xf32>, vector<8x8xf32> -> vector<16x8xf32>
    %163 = arith.truncf %162 : vector<16x8xf32> to vector<16x8xbf16>
    %cst_90 = arith.constant dense<0.000000e+00> : vector<16x32xf32>
    %164 = tpu.matmul %163, %92, %cst_90 {dimension_numbers = #tpu.dot_dimension_numbers<[1], [0], [0], [1], [0, 0, 1, 1], [], []>} : vector<16x8xbf16>, vector<8x32xbf16>, vector<16x32xf32> -> vector<16x32xf32>
    %165 = arith.addf %84, %164 : vector<16x32xf32>
    %c2 = arith.constant 2 : index
    %c0_91 = arith.constant 0 : index
    %c0_92 = arith.constant 0 : index
    %166 = vector.load %arg2[%c2, %c0_91, %c0_92] : memref<4x32x8xbf16, #tpu.memory_space<vmem>>, vector<1x32x8xbf16>
    %167 = vector.shape_cast %166 : vector<1x32x8xbf16> to vector<32x8xbf16>
    %c2_93 = arith.constant 2 : index
    %c0_94 = arith.constant 0 : index
    %c0_95 = arith.constant 0 : index
    %168 = vector.load %arg4[%c2_93, %c0_94, %c0_95] : memref<4x32x8xbf16, #tpu.memory_space<vmem>>, vector<1x32x8xbf16>
    %169 = vector.shape_cast %168 : vector<1x32x8xbf16> to vector<32x8xbf16>
    %c2_96 = arith.constant 2 : index
    %c0_97 = arith.constant 0 : index
    %c0_98 = arith.constant 0 : index
    %170 = vector.load %arg6[%c2_96, %c0_97, %c0_98] : memref<4x32x8xbf16, #tpu.memory_space<vmem>>, vector<1x32x8xbf16>
    %171 = vector.shape_cast %170 : vector<1x32x8xbf16> to vector<32x8xbf16>
    %c2_99 = arith.constant 2 : index
    %c0_100 = arith.constant 0 : index
    %c0_101 = arith.constant 0 : index
    %172 = vector.load %arg10[%c2_99, %c0_100, %c0_101] : memref<4x8x32xbf16, #tpu.memory_space<vmem>>, vector<1x8x32xbf16>
    %173 = vector.shape_cast %172 : vector<1x8x32xbf16> to vector<8x32xbf16>
    %c2_102 = arith.constant 2 : index
    %c0_103 = arith.constant 0 : index
    %c0_104 = arith.constant 0 : index
    %174 = vector.load %arg8[%c2_102, %c0_103, %c0_104] : memref<4x8x8xbf16, #tpu.memory_space<vmem>>, vector<1x8x8xbf16>
    %175 = vector.shape_cast %174 : vector<1x8x8xbf16> to vector<8x8xbf16>
    %c2_105 = arith.constant 2 : index
    %c0_106 = arith.constant 0 : index
    %c0_107 = arith.constant 0 : index
    %176 = vector.load %arg9[%c2_105, %c0_106, %c0_107] : memref<4x8x8xbf16, #tpu.memory_space<vmem>>, vector<1x8x8xbf16>
    %177 = vector.shape_cast %176 : vector<1x8x8xbf16> to vector<8x8xbf16>
    %cst_108 = arith.constant dense<0.000000e+00> : vector<16x8xf32>
    %178 = tpu.matmul %2, %167, %cst_108 {dimension_numbers = #tpu.dot_dimension_numbers<[1], [0], [0], [1], [0, 0, 1, 1], [], []>} : vector<16x32xbf16>, vector<32x8xbf16>, vector<16x8xf32> -> vector<16x8xf32>
    %c2_109 = arith.constant 2 : index
    %c0_110 = arith.constant 0 : index
    %c0_111 = arith.constant 0 : index
    %179 = vector.load %arg3[%c2_109, %c0_110, %c0_111] : memref<4x1x8xf32, #tpu.memory_space<vmem>>, vector<1x1x8xf32>
    %180 = vector.shape_cast %179 : vector<1x1x8xf32> to vector<1x8xf32>
    %181 = vector.broadcast %180 : vector<1x8xf32> to vector<16x8xf32>
    %182 = arith.addf %178, %181 : vector<16x8xf32>
    %cst_112 = arith.constant dense<0.000000e+00> : vector<16x8xf32>
    %183 = tpu.matmul %2, %169, %cst_112 {dimension_numbers = #tpu.dot_dimension_numbers<[1], [0], [0], [1], [0, 0, 1, 1], [], []>} : vector<16x32xbf16>, vector<32x8xbf16>, vector<16x8xf32> -> vector<16x8xf32>
    %c2_113 = arith.constant 2 : index
    %c0_114 = arith.constant 0 : index
    %c0_115 = arith.constant 0 : index
    %184 = vector.load %arg5[%c2_113, %c0_114, %c0_115] : memref<4x1x8xf32, #tpu.memory_space<vmem>>, vector<1x1x8xf32>
    %185 = vector.shape_cast %184 : vector<1x1x8xf32> to vector<1x8xf32>
    %186 = vector.broadcast %185 : vector<1x8xf32> to vector<16x8xf32>
    %187 = arith.addf %183, %186 : vector<16x8xf32>
    %cst_116 = arith.constant dense<0.000000e+00> : vector<16x8xf32>
    %188 = tpu.matmul %2, %171, %cst_116 {dimension_numbers = #tpu.dot_dimension_numbers<[1], [0], [0], [1], [0, 0, 1, 1], [], []>} : vector<16x32xbf16>, vector<32x8xbf16>, vector<16x8xf32> -> vector<16x8xf32>
    %c2_117 = arith.constant 2 : index
    %c0_118 = arith.constant 0 : index
    %c0_119 = arith.constant 0 : index
    %189 = vector.load %arg7[%c2_117, %c0_118, %c0_119] : memref<4x1x8xf32, #tpu.memory_space<vmem>>, vector<1x1x8xf32>
    %190 = vector.shape_cast %189 : vector<1x1x8xf32> to vector<1x8xf32>
    %191 = vector.broadcast %190 : vector<1x8xf32> to vector<16x8xf32>
    %192 = arith.addf %188, %191 : vector<16x8xf32>
    %193 = vector.extract_strided_slice %182 {offsets = [0, 0], sizes = [8, 8], strides = [1, 1]} : vector<16x8xf32> to vector<8x8xf32>
    %194 = arith.truncf %193 : vector<8x8xf32> to vector<8x8xbf16>
    %195 = vector.extract_strided_slice %187 {offsets = [0, 0], sizes = [8, 8], strides = [1, 1]} : vector<16x8xf32> to vector<8x8xf32>
    %196 = arith.truncf %195 : vector<8x8xf32> to vector<8x8xbf16>
    %197 = vector.extract_strided_slice %192 {offsets = [0, 0], sizes = [8, 8], strides = [1, 1]} : vector<16x8xf32> to vector<8x8xf32>
    %198 = arith.truncf %197 : vector<8x8xf32> to vector<8x8xbf16>
    %cst_120 = arith.constant dense<0.000000e+00> : vector<8x8xf32>
    %199 = tpu.matmul %175, %196, %cst_120 {dimension_numbers = #tpu.dot_dimension_numbers<[1], [0], [0], [1], [0, 0, 1, 1], [], []>} : vector<8x8xbf16>, vector<8x8xbf16>, vector<8x8xf32> -> vector<8x8xf32>
    %cst_121 = arith.constant dense<0.000000e+00> : vector<8x8xf32>
    %200 = tpu.matmul %177, %198, %cst_121 {dimension_numbers = #tpu.dot_dimension_numbers<[1], [0], [0], [1], [0, 0, 1, 1], [], []>} : vector<8x8xbf16>, vector<8x8xbf16>, vector<8x8xf32> -> vector<8x8xf32>
    %201 = arith.truncf %199 : vector<8x8xf32> to vector<8x8xbf16>
    %cst_122 = arith.constant dense<0.000000e+00> : vector<8x8xf32>
    %202 = tpu.matmul %194, %201, %cst_122 {dimension_numbers = #tpu.dot_dimension_numbers<[1], [1], [0], [0], [0, 0, 1, 0], [], []>} : vector<8x8xbf16>, vector<8x8xbf16>, vector<8x8xf32> -> vector<8x8xf32>
    %cst_123 = arith.constant 0.353553385 : f32
    %203 = vector.broadcast %cst_123 : f32 to vector<8x8xf32>
    %204 = arith.mulf %202, %203 : vector<8x8xf32>
    %cst_124 = arith.constant dense<0xFF800000> : vector<8xf32>
    %205 = vector.multi_reduction <maximumf>, %204, %cst_124 [1] : vector<8x8xf32> to vector<8xf32>
    %206 = vector.shape_cast %205 : vector<8xf32> to vector<8x1xf32>
    %207 = vector.broadcast %206 : vector<8x1xf32> to vector<8x8xf32>
    %208 = arith.subf %204, %207 : vector<8x8xf32>
    %209 = math.exp %208 : vector<8x8xf32>
    %cst_125 = arith.constant dense<0.000000e+00> : vector<8xf32>
    %210 = vector.multi_reduction <add>, %209, %cst_125 [1] : vector<8x8xf32> to vector<8xf32>
    %211 = vector.shape_cast %210 : vector<8xf32> to vector<8x1xf32>
    %212 = tpu.reciprocal %211 {approx = true} : vector<8x1xf32> -> vector<8x1xf32>
    %213 = vector.broadcast %212 : vector<8x1xf32> to vector<8x8xf32>
    %214 = arith.mulf %209, %213 : vector<8x8xf32>
    %215 = arith.truncf %214 : vector<8x8xf32> to vector<8x8xbf16>
    %216 = arith.truncf %200 : vector<8x8xf32> to vector<8x8xbf16>
    %cst_126 = arith.constant dense<0.000000e+00> : vector<8x8xf32>
    %217 = tpu.matmul %215, %216, %cst_126 {dimension_numbers = #tpu.dot_dimension_numbers<[1], [0], [0], [1], [0, 0, 1, 1], [], []>} : vector<8x8xbf16>, vector<8x8xbf16>, vector<8x8xf32> -> vector<8x8xf32>
    %218 = vector.extract_strided_slice %182 {offsets = [8, 0], sizes = [8, 8], strides = [1, 1]} : vector<16x8xf32> to vector<8x8xf32>
    %219 = arith.truncf %218 : vector<8x8xf32> to vector<8x8xbf16>
    %220 = vector.extract_strided_slice %187 {offsets = [8, 0], sizes = [8, 8], strides = [1, 1]} : vector<16x8xf32> to vector<8x8xf32>
    %221 = arith.truncf %220 : vector<8x8xf32> to vector<8x8xbf16>
    %222 = vector.extract_strided_slice %192 {offsets = [8, 0], sizes = [8, 8], strides = [1, 1]} : vector<16x8xf32> to vector<8x8xf32>
    %223 = arith.truncf %222 : vector<8x8xf32> to vector<8x8xbf16>
    %cst_127 = arith.constant dense<0.000000e+00> : vector<8x8xf32>
    %224 = tpu.matmul %175, %221, %cst_127 {dimension_numbers = #tpu.dot_dimension_numbers<[1], [0], [0], [1], [0, 0, 1, 1], [], []>} : vector<8x8xbf16>, vector<8x8xbf16>, vector<8x8xf32> -> vector<8x8xf32>
    %cst_128 = arith.constant dense<0.000000e+00> : vector<8x8xf32>
    %225 = tpu.matmul %177, %223, %cst_128 {dimension_numbers = #tpu.dot_dimension_numbers<[1], [0], [0], [1], [0, 0, 1, 1], [], []>} : vector<8x8xbf16>, vector<8x8xbf16>, vector<8x8xf32> -> vector<8x8xf32>
    %226 = arith.truncf %224 : vector<8x8xf32> to vector<8x8xbf16>
    %cst_129 = arith.constant dense<0.000000e+00> : vector<8x8xf32>
    %227 = tpu.matmul %219, %226, %cst_129 {dimension_numbers = #tpu.dot_dimension_numbers<[1], [1], [0], [0], [0, 0, 1, 0], [], []>} : vector<8x8xbf16>, vector<8x8xbf16>, vector<8x8xf32> -> vector<8x8xf32>
    %cst_130 = arith.constant 0.353553385 : f32
    %228 = vector.broadcast %cst_130 : f32 to vector<8x8xf32>
    %229 = arith.mulf %227, %228 : vector<8x8xf32>
    %cst_131 = arith.constant dense<0xFF800000> : vector<8xf32>
    %230 = vector.multi_reduction <maximumf>, %229, %cst_131 [1] : vector<8x8xf32> to vector<8xf32>
    %231 = vector.shape_cast %230 : vector<8xf32> to vector<8x1xf32>
    %232 = vector.broadcast %231 : vector<8x1xf32> to vector<8x8xf32>
    %233 = arith.subf %229, %232 : vector<8x8xf32>
    %234 = math.exp %233 : vector<8x8xf32>
    %cst_132 = arith.constant dense<0.000000e+00> : vector<8xf32>
    %235 = vector.multi_reduction <add>, %234, %cst_132 [1] : vector<8x8xf32> to vector<8xf32>
    %236 = vector.shape_cast %235 : vector<8xf32> to vector<8x1xf32>
    %237 = tpu.reciprocal %236 {approx = true} : vector<8x1xf32> -> vector<8x1xf32>
    %238 = vector.broadcast %237 : vector<8x1xf32> to vector<8x8xf32>
    %239 = arith.mulf %234, %238 : vector<8x8xf32>
    %240 = arith.truncf %239 : vector<8x8xf32> to vector<8x8xbf16>
    %241 = arith.truncf %225 : vector<8x8xf32> to vector<8x8xbf16>
    %cst_133 = arith.constant dense<0.000000e+00> : vector<8x8xf32>
    %242 = tpu.matmul %240, %241, %cst_133 {dimension_numbers = #tpu.dot_dimension_numbers<[1], [0], [0], [1], [0, 0, 1, 1], [], []>} : vector<8x8xbf16>, vector<8x8xbf16>, vector<8x8xf32> -> vector<8x8xf32>
    %243 = tpu.concatenate %217, %242 in 0 : vector<8x8xf32>, vector<8x8xf32> -> vector<16x8xf32>
    %244 = arith.truncf %243 : vector<16x8xf32> to vector<16x8xbf16>
    %cst_134 = arith.constant dense<0.000000e+00> : vector<16x32xf32>
    %245 = tpu.matmul %244, %173, %cst_134 {dimension_numbers = #tpu.dot_dimension_numbers<[1], [0], [0], [1], [0, 0, 1, 1], [], []>} : vector<16x8xbf16>, vector<8x32xbf16>, vector<16x32xf32> -> vector<16x32xf32>
    %246 = arith.addf %165, %245 : vector<16x32xf32>
    %c3 = arith.constant 3 : index
    %c0_135 = arith.constant 0 : index
    %c0_136 = arith.constant 0 : index
    %247 = vector.load %arg2[%c3, %c0_135, %c0_136] : memref<4x32x8xbf16, #tpu.memory_space<vmem>>, vector<1x32x8xbf16>
    %248 = vector.shape_cast %247 : vector<1x32x8xbf16> to vector<32x8xbf16>
    %c3_137 = arith.constant 3 : index
    %c0_138 = arith.constant 0 : index
    %c0_139 = arith.constant 0 : index
    %249 = vector.load %arg4[%c3_137, %c0_138, %c0_139] : memref<4x32x8xbf16, #tpu.memory_space<vmem>>, vector<1x32x8xbf16>
    %250 = vector.shape_cast %249 : vector<1x32x8xbf16> to vector<32x8xbf16>
    %c3_140 = arith.constant 3 : index
    %c0_141 = arith.constant 0 : index
    %c0_142 = arith.constant 0 : index
    %251 = vector.load %arg6[%c3_140, %c0_141, %c0_142] : memref<4x32x8xbf16, #tpu.memory_space<vmem>>, vector<1x32x8xbf16>
    %252 = vector.shape_cast %251 : vector<1x32x8xbf16> to vector<32x8xbf16>
    %c3_143 = arith.constant 3 : index
    %c0_144 = arith.constant 0 : index
    %c0_145 = arith.constant 0 : index
    %253 = vector.load %arg10[%c3_143, %c0_144, %c0_145] : memref<4x8x32xbf16, #tpu.memory_space<vmem>>, vector<1x8x32xbf16>
    %254 = vector.shape_cast %253 : vector<1x8x32xbf16> to vector<8x32xbf16>
    %c3_146 = arith.constant 3 : index
    %c0_147 = arith.constant 0 : index
    %c0_148 = arith.constant 0 : index
    %255 = vector.load %arg8[%c3_146, %c0_147, %c0_148] : memref<4x8x8xbf16, #tpu.memory_space<vmem>>, vector<1x8x8xbf16>
    %256 = vector.shape_cast %255 : vector<1x8x8xbf16> to vector<8x8xbf16>
    %c3_149 = arith.constant 3 : index
    %c0_150 = arith.constant 0 : index
    %c0_151 = arith.constant 0 : index
    %257 = vector.load %arg9[%c3_149, %c0_150, %c0_151] : memref<4x8x8xbf16, #tpu.memory_space<vmem>>, vector<1x8x8xbf16>
    %258 = vector.shape_cast %257 : vector<1x8x8xbf16> to vector<8x8xbf16>
    %cst_152 = arith.constant dense<0.000000e+00> : vector<16x8xf32>
    %259 = tpu.matmul %2, %248, %cst_152 {dimension_numbers = #tpu.dot_dimension_numbers<[1], [0], [0], [1], [0, 0, 1, 1], [], []>} : vector<16x32xbf16>, vector<32x8xbf16>, vector<16x8xf32> -> vector<16x8xf32>
    %c3_153 = arith.constant 3 : index
    %c0_154 = arith.constant 0 : index
    %c0_155 = arith.constant 0 : index
    %260 = vector.load %arg3[%c3_153, %c0_154, %c0_155] : memref<4x1x8xf32, #tpu.memory_space<vmem>>, vector<1x1x8xf32>
    %261 = vector.shape_cast %260 : vector<1x1x8xf32> to vector<1x8xf32>
    %262 = vector.broadcast %261 : vector<1x8xf32> to vector<16x8xf32>
    %263 = arith.addf %259, %262 : vector<16x8xf32>
    %cst_156 = arith.constant dense<0.000000e+00> : vector<16x8xf32>
    %264 = tpu.matmul %2, %250, %cst_156 {dimension_numbers = #tpu.dot_dimension_numbers<[1], [0], [0], [1], [0, 0, 1, 1], [], []>} : vector<16x32xbf16>, vector<32x8xbf16>, vector<16x8xf32> -> vector<16x8xf32>
    %c3_157 = arith.constant 3 : index
    %c0_158 = arith.constant 0 : index
    %c0_159 = arith.constant 0 : index
    %265 = vector.load %arg5[%c3_157, %c0_158, %c0_159] : memref<4x1x8xf32, #tpu.memory_space<vmem>>, vector<1x1x8xf32>
    %266 = vector.shape_cast %265 : vector<1x1x8xf32> to vector<1x8xf32>
    %267 = vector.broadcast %266 : vector<1x8xf32> to vector<16x8xf32>
    %268 = arith.addf %264, %267 : vector<16x8xf32>
    %cst_160 = arith.constant dense<0.000000e+00> : vector<16x8xf32>
    %269 = tpu.matmul %2, %252, %cst_160 {dimension_numbers = #tpu.dot_dimension_numbers<[1], [0], [0], [1], [0, 0, 1, 1], [], []>} : vector<16x32xbf16>, vector<32x8xbf16>, vector<16x8xf32> -> vector<16x8xf32>
    %c3_161 = arith.constant 3 : index
    %c0_162 = arith.constant 0 : index
    %c0_163 = arith.constant 0 : index
    %270 = vector.load %arg7[%c3_161, %c0_162, %c0_163] : memref<4x1x8xf32, #tpu.memory_space<vmem>>, vector<1x1x8xf32>
    %271 = vector.shape_cast %270 : vector<1x1x8xf32> to vector<1x8xf32>
    %272 = vector.broadcast %271 : vector<1x8xf32> to vector<16x8xf32>
    %273 = arith.addf %269, %272 : vector<16x8xf32>
    %274 = vector.extract_strided_slice %263 {offsets = [0, 0], sizes = [8, 8], strides = [1, 1]} : vector<16x8xf32> to vector<8x8xf32>
    %275 = arith.truncf %274 : vector<8x8xf32> to vector<8x8xbf16>
    %276 = vector.extract_strided_slice %268 {offsets = [0, 0], sizes = [8, 8], strides = [1, 1]} : vector<16x8xf32> to vector<8x8xf32>
    %277 = arith.truncf %276 : vector<8x8xf32> to vector<8x8xbf16>
    %278 = vector.extract_strided_slice %273 {offsets = [0, 0], sizes = [8, 8], strides = [1, 1]} : vector<16x8xf32> to vector<8x8xf32>
    %279 = arith.truncf %278 : vector<8x8xf32> to vector<8x8xbf16>
    %cst_164 = arith.constant dense<0.000000e+00> : vector<8x8xf32>
    %280 = tpu.matmul %256, %277, %cst_164 {dimension_numbers = #tpu.dot_dimension_numbers<[1], [0], [0], [1], [0, 0, 1, 1], [], []>} : vector<8x8xbf16>, vector<8x8xbf16>, vector<8x8xf32> -> vector<8x8xf32>
    %cst_165 = arith.constant dense<0.000000e+00> : vector<8x8xf32>
    %281 = tpu.matmul %258, %279, %cst_165 {dimension_numbers = #tpu.dot_dimension_numbers<[1], [0], [0], [1], [0, 0, 1, 1], [], []>} : vector<8x8xbf16>, vector<8x8xbf16>, vector<8x8xf32> -> vector<8x8xf32>
    %282 = arith.truncf %280 : vector<8x8xf32> to vector<8x8xbf16>
    %cst_166 = arith.constant dense<0.000000e+00> : vector<8x8xf32>
    %283 = tpu.matmul %275, %282, %cst_166 {dimension_numbers = #tpu.dot_dimension_numbers<[1], [1], [0], [0], [0, 0, 1, 0], [], []>} : vector<8x8xbf16>, vector<8x8xbf16>, vector<8x8xf32> -> vector<8x8xf32>
    %cst_167 = arith.constant 0.353553385 : f32
    %284 = vector.broadcast %cst_167 : f32 to vector<8x8xf32>
    %285 = arith.mulf %283, %284 : vector<8x8xf32>
    %cst_168 = arith.constant dense<0xFF800000> : vector<8xf32>
    %286 = vector.multi_reduction <maximumf>, %285, %cst_168 [1] : vector<8x8xf32> to vector<8xf32>
    %287 = vector.shape_cast %286 : vector<8xf32> to vector<8x1xf32>
    %288 = vector.broadcast %287 : vector<8x1xf32> to vector<8x8xf32>
    %289 = arith.subf %285, %288 : vector<8x8xf32>
    %290 = math.exp %289 : vector<8x8xf32>
    %cst_169 = arith.constant dense<0.000000e+00> : vector<8xf32>
    %291 = vector.multi_reduction <add>, %290, %cst_169 [1] : vector<8x8xf32> to vector<8xf32>
    %292 = vector.shape_cast %291 : vector<8xf32> to vector<8x1xf32>
    %293 = tpu.reciprocal %292 {approx = true} : vector<8x1xf32> -> vector<8x1xf32>
    %294 = vector.broadcast %293 : vector<8x1xf32> to vector<8x8xf32>
    %295 = arith.mulf %290, %294 : vector<8x8xf32>
    %296 = arith.truncf %295 : vector<8x8xf32> to vector<8x8xbf16>
    %297 = arith.truncf %281 : vector<8x8xf32> to vector<8x8xbf16>
    %cst_170 = arith.constant dense<0.000000e+00> : vector<8x8xf32>
    %298 = tpu.matmul %296, %297, %cst_170 {dimension_numbers = #tpu.dot_dimension_numbers<[1], [0], [0], [1], [0, 0, 1, 1], [], []>} : vector<8x8xbf16>, vector<8x8xbf16>, vector<8x8xf32> -> vector<8x8xf32>
    %299 = vector.extract_strided_slice %263 {offsets = [8, 0], sizes = [8, 8], strides = [1, 1]} : vector<16x8xf32> to vector<8x8xf32>
    %300 = arith.truncf %299 : vector<8x8xf32> to vector<8x8xbf16>
    %301 = vector.extract_strided_slice %268 {offsets = [8, 0], sizes = [8, 8], strides = [1, 1]} : vector<16x8xf32> to vector<8x8xf32>
    %302 = arith.truncf %301 : vector<8x8xf32> to vector<8x8xbf16>
    %303 = vector.extract_strided_slice %273 {offsets = [8, 0], sizes = [8, 8], strides = [1, 1]} : vector<16x8xf32> to vector<8x8xf32>
    %304 = arith.truncf %303 : vector<8x8xf32> to vector<8x8xbf16>
    %cst_171 = arith.constant dense<0.000000e+00> : vector<8x8xf32>
    %305 = tpu.matmul %256, %302, %cst_171 {dimension_numbers = #tpu.dot_dimension_numbers<[1], [0], [0], [1], [0, 0, 1, 1], [], []>} : vector<8x8xbf16>, vector<8x8xbf16>, vector<8x8xf32> -> vector<8x8xf32>
    %cst_172 = arith.constant dense<0.000000e+00> : vector<8x8xf32>
    %306 = tpu.matmul %258, %304, %cst_172 {dimension_numbers = #tpu.dot_dimension_numbers<[1], [0], [0], [1], [0, 0, 1, 1], [], []>} : vector<8x8xbf16>, vector<8x8xbf16>, vector<8x8xf32> -> vector<8x8xf32>
    %307 = arith.truncf %305 : vector<8x8xf32> to vector<8x8xbf16>
    %cst_173 = arith.constant dense<0.000000e+00> : vector<8x8xf32>
    %308 = tpu.matmul %300, %307, %cst_173 {dimension_numbers = #tpu.dot_dimension_numbers<[1], [1], [0], [0], [0, 0, 1, 0], [], []>} : vector<8x8xbf16>, vector<8x8xbf16>, vector<8x8xf32> -> vector<8x8xf32>
    %cst_174 = arith.constant 0.353553385 : f32
    %309 = vector.broadcast %cst_174 : f32 to vector<8x8xf32>
    %310 = arith.mulf %308, %309 : vector<8x8xf32>
    %cst_175 = arith.constant dense<0xFF800000> : vector<8xf32>
    %311 = vector.multi_reduction <maximumf>, %310, %cst_175 [1] : vector<8x8xf32> to vector<8xf32>
    %312 = vector.shape_cast %311 : vector<8xf32> to vector<8x1xf32>
    %313 = vector.broadcast %312 : vector<8x1xf32> to vector<8x8xf32>
    %314 = arith.subf %310, %313 : vector<8x8xf32>
    %315 = math.exp %314 : vector<8x8xf32>
    %cst_176 = arith.constant dense<0.000000e+00> : vector<8xf32>
    %316 = vector.multi_reduction <add>, %315, %cst_176 [1] : vector<8x8xf32> to vector<8xf32>
    %317 = vector.shape_cast %316 : vector<8xf32> to vector<8x1xf32>
    %318 = tpu.reciprocal %317 {approx = true} : vector<8x1xf32> -> vector<8x1xf32>
    %319 = vector.broadcast %318 : vector<8x1xf32> to vector<8x8xf32>
    %320 = arith.mulf %315, %319 : vector<8x8xf32>
    %321 = arith.truncf %320 : vector<8x8xf32> to vector<8x8xbf16>
    %322 = arith.truncf %306 : vector<8x8xf32> to vector<8x8xbf16>
    %cst_177 = arith.constant dense<0.000000e+00> : vector<8x8xf32>
    %323 = tpu.matmul %321, %322, %cst_177 {dimension_numbers = #tpu.dot_dimension_numbers<[1], [0], [0], [1], [0, 0, 1, 1], [], []>} : vector<8x8xbf16>, vector<8x8xbf16>, vector<8x8xf32> -> vector<8x8xf32>
    %324 = tpu.concatenate %298, %323 in 0 : vector<8x8xf32>, vector<8x8xf32> -> vector<16x8xf32>
    %325 = arith.truncf %324 : vector<16x8xf32> to vector<16x8xbf16>
    %cst_178 = arith.constant dense<0.000000e+00> : vector<16x32xf32>
    %326 = tpu.matmul %325, %254, %cst_178 {dimension_numbers = #tpu.dot_dimension_numbers<[1], [0], [0], [1], [0, 0, 1, 1], [], []>} : vector<16x8xbf16>, vector<8x32xbf16>, vector<16x32xf32> -> vector<16x32xf32>
    %327 = arith.addf %246, %326 : vector<16x32xf32>
    %c0_179 = arith.constant 0 : index
    %c0_180 = arith.constant 0 : index
    %328 = vector.load %arg11[%c0_179, %c0_180] : memref<1x32xf32, #tpu.memory_space<vmem>>, vector<1x32xf32>
    %329 = vector.broadcast %328 : vector<1x32xf32> to vector<16x32xf32>
    %330 = arith.addf %327, %329 : vector<16x32xf32>
    %331 = vector.shape_cast %330 : vector<16x32xf32> to vector<2x8x32xf32>
    %c0_181 = arith.constant 0 : index
    %c0_182 = arith.constant 0 : index
    %c0_183 = arith.constant 0 : index
    %332 = vector.load %arg12[%c0_181, %c0_182, %c0_183] : memref<2x8x32xf32, #tpu.memory_space<vmem>>, vector<2x8x32xf32>
    tpu.vector_store %arg12[%c0_181, %c0_182, %c0_183], %331 {strides = array<i32>} : memref<2x8x32xf32, #tpu.memory_space<vmem>>, vector<2x8x32xf32>,
    return
  }
  func.func @transform_0(%arg0: i32) -> (i32, i32, i32) {
    %c0_i32 = arith.constant 0 : i32
    %c0_i32_0 = arith.constant 0 : i32
    %c0_i32_1 = arith.constant 0 : i32
    return %arg0, %c0_i32, %c0_i32_0 : i32, i32, i32
  }
  func.func @transform_1(%arg0: i32) -> (i32, i32, i32) {
    %c0_i32 = arith.constant 0 : i32
    %c0_i32_0 = arith.constant 0 : i32
    %c0_i32_1 = arith.constant 0 : i32
    %c0_i32_2 = arith.constant 0 : i32
    return %c0_i32, %c0_i32_0, %c0_i32_1 : i32, i32, i32
  }
  func.func @transform_2(%arg0: i32) -> (i32, i32, i32) {
    %c0_i32 = arith.constant 0 : i32
    %c0_i32_0 = arith.constant 0 : i32
    %c0_i32_1 = arith.constant 0 : i32
    %c0_i32_2 = arith.constant 0 : i32
    return %c0_i32, %c0_i32_0, %c0_i32_1 : i32, i32, i32
  }
  func.func @transform_3(%arg0: i32) -> (i32, i32, i32) {
    %c0_i32 = arith.constant 0 : i32
    %c0_i32_0 = arith.constant 0 : i32
    %c0_i32_1 = arith.constant 0 : i32
    %c0_i32_2 = arith.constant 0 : i32
    return %c0_i32, %c0_i32_0, %c0_i32_1 : i32, i32, i32
  }
  func.func @transform_4(%arg0: i32) -> (i32, i32, i32) {
    %c0_i32 = arith.constant 0 : i32
    %c0_i32_0 = arith.constant 0 : i32
    %c0_i32_1 = arith.constant 0 : i32
    %c0_i32_2 = arith.constant 0 : i32
    return %c0_i32, %c0_i32_0, %c0_i32_1 : i32, i32, i32
  }
  func.func @transform_5(%arg0: i32) -> (i32, i32, i32) {
    %c0_i32 = arith.constant 0 : i32
    %c0_i32_0 = arith.constant 0 : i32
    %c0_i32_1 = arith.constant 0 : i32
    %c0_i32_2 = arith.constant 0 : i32
    return %c0_i32, %c0_i32_0, %c0_i32_1 : i32, i32, i32
  }
  func.func @transform_6(%arg0: i32) -> (i32, i32, i32) {
    %c0_i32 = arith.constant 0 : i32
    %c0_i32_0 = arith.constant 0 : i32
    %c0_i32_1 = arith.constant 0 : i32
    %c0_i32_2 = arith.constant 0 : i32
    return %c0_i32, %c0_i32_0, %c0_i32_1 : i32, i32, i32
  }
  func.func @transform_7(%arg0: i32) -> (i32, i32, i32) {
    %c0_i32 = arith.constant 0 : i32
    %c0_i32_0 = arith.constant 0 : i32
    %c0_i32_1 = arith.constant 0 : i32
    %c0_i32_2 = arith.constant 0 : i32
    return %c0_i32, %c0_i32_0, %c0_i32_1 : i32, i32, i32
  }
  func.func @transform_8(%arg0: i32) -> (i32, i32, i32) {
    %c0_i32 = arith.constant 0 : i32
    %c0_i32_0 = arith.constant 0 : i32
    %c0_i32_1 = arith.constant 0 : i32
    %c0_i32_2 = arith.constant 0 : i32
    return %c0_i32, %c0_i32_0, %c0_i32_1 : i32, i32, i32
  }
  func.func @transform_9(%arg0: i32) -> (i32, i32, i32) {
    %c0_i32 = arith.constant 0 : i32
    %c0_i32_0 = arith.constant 0 : i32
    %c0_i32_1 = arith.constant 0 : i32
    %c0_i32_2 = arith.constant 0 : i32
    return %c0_i32, %c0_i32_0, %c0_i32_1 : i32, i32, i32
  }
  func.func @transform_10(%arg0: i32) -> (i32, i32) {
    %c0_i32 = arith.constant 0 : i32
    %c0_i32_0 = arith.constant 0 : i32
    %c0_i32_1 = arith.constant 0 : i32
    return %c0_i32, %c0_i32_0 : i32, i32
  }
  func.func @transform_11(%arg0: i32) -> (i32, i32, i32) {
    %c0_i32 = arith.constant 0 : i32
    %c0_i32_0 = arith.constant 0 : i32
    %c0_i32_1 = arith.constant 0 : i32
    return %arg0, %c0_i32, %c0_i32_0 : i32, i32, i32
  }
}

</mosaic_0001>

<bundles_post_ra>
// kernel: tpu_custom_call.1
= control target key start
LH: loop header
LB: loop body
LE: loop exit
PB: predicated region body
PF: predicated region fallthrough
CT: control target
= control target key end

     0   :  { %v3315_v1 = vmov 0.0   ;;  %vm3316_vm0 = vmmov 0   ;;  %vm77_vm1 = vcmask 261120   ;;  %s3838_s0 = inlined_call_operand.vmem [shape: f32[2,8,32], index: 0, kind: input, shape index: {}]   ;;  %s3839_s1 = inlined_call_operand.vmem [shape: bf16[4,32,8], index: 1, kind: input, shape index: {}]   ;;  %s3840_s2 = inlined_call_operand.vmem [shape: f32[4,1,8], index: 2, kind: input, shape index: {}]   ;;  %s3841_s3 = inlined_call_operand.vmem [shape: bf16[4,32,8], index: 3, kind: input, shape index: {}]   ;;  %s3842_s4 = inlined_call_operand.vmem [shape: f32[4,1,8], index: 4, kind: input, shape index: {}]   ;;  %s3843_s5 = inlined_call_operand.vmem [shape: bf16[4,32,8], index: 5, kind: input, shape index: {}]   ;;  %s3844_s6 = inlined_call_operand.vmem [shape: f32[4,1,8], index: 6, kind: input, shape index: {}]   ;;  %s3845_s7 = inlined_call_operand.vmem [shape: bf16[4,8,8], index: 7, kind: input, shape index: {}]   ;;  %s3846_s8 = inlined_call_operand.vmem [shape: bf16[4,8,8], index: 8, kind: input, shape index: {}]   ;;  %s3847_s9 = inlined_call_operand.vmem [shape: bf16[4,8,32], index: 9, kind: input, shape index: {}]   ;;  %s3848_s10 = inlined_call_operand.vmem [shape: f32[1,32], index: 10, kind: input, shape index: {}]   ;;  %s3849_s11 = inlined_call_operand.hbm [shape: f32[2,8,32], index: 11, kind: output, shape index: {}]  }
   0x1   :  { %v3235_v0 = vld [vmem:[%s3841_s3] sm:$0xff]   ;;  %2926 = vmatprep.subr.bf16.mxu1 %v3315_v1  ;;  %2918 = vmatprep.subr.bf16.mxu0 %v3315_v1  ;;  %v3236_v2 = vld [vmem:[%s3841_s3 + $0x8] sm:$0xff]  }
   0x2   :  { %2927 = vmatpush3.bf16.msra.mxu1 %v3235_v0  ;;  %2930 = vmatprep.mubr.msk.bf16.mxu1 %vm3316_vm0, %v3315_v1  ;;  %v40_v3 = vld [vmem:[%s3838_s0] sm:$0xff]  ;;  %v41_v4 = vld [vmem:[%s3838_s0 + $0x8] sm:$0xff] }
   0x3   :  { %2928 = vmatprep.subr.bf16.mxu1 %v3315_v1  ;;  %2922 = vmatprep.mubr.msk.bf16.mxu0 %vm3316_vm0, %v3315_v1  ;;  %v3399_v5 = vpack.c.bf16 %v41_v4, %v40_v3 }
   0x6   :  { %2929 = vmatpush3.bf16.msra.mxu1 %v3236_v2 }
   0x7   :  { %2942 = vmatprep.subr.bf16.mxu1 %v3315_v1 }
   0x9   :  { %2931 = vmatmul.mubr.msk.bf16.vlgmr.msra.gmra.mrb[0].mxu1 %vm77_vm1, %v3399_v5 }
   0xa   :  { %2944 = vmatprep.mubr.msk.bf16.mxu1 %vm3316_vm0, %v3315_v1 }
   0xb   :  { %16 = vsyncpa [#allocation3], 0  ;;  %v3237_v6 = vld [vmem:[%s3839_s1] sm:$0xff]   ;;  %v3238_v7 = vld [vmem:[%s3839_s1 + $0x8] sm:$0xff]   ;;  %vm249_vm2 = vcmask 1043456   ;;  %vm245_vm3 = vcmask 64512  }
   0xc   :  { %2919 = vmatpush3.bf16.msra.mxu0 %v3237_v6  ;;  %v2675_v8 = vld [vmem:[%s3842_s4] ss:$0 sm:$0xff]  ;;  %v3240_v25 = vld [vmem:[%s3843_s5 + $0x8] sm:$0xff]  }
   0xd   :  { %2920 = vmatprep.subr.bf16.mxu0 %v3315_v1  ;;  %v56_v17 = vld [vmem:[%s3845_s7] sm:$0xf] }
   0xe   :  { %v2671_v18 = vld [vmem:[%s3840_s2] ss:$0 sm:$0xff] }
   0xf   :  { %v3239_v24 = vld [vmem:[%s3843_s5] sm:$0xff]  }
  0x10   :  { %2921 = vmatpush3.bf16.msra.mxu0 %v3238_v7  ;;  %v2679_v36 = vld [vmem:[%s3844_s6] ss:$0 sm:$0xff] }
  0x11   :  { %2934 = vmatprep.subr.bf16.mxu0 %v3315_v1  ;;  %v57_v45 = vld [vmem:[%s3846_s8] sm:$0xf] }
  0x13   :  { %2923 = vmatmul.mubr.msk.bf16.vlgmr.msra.gmra.mrb[0].mxu0 %vm77_vm1, %v3399_v5 }
  0x14   :  { %2938 = vmatprep.mubr.msk.bf16.mxu0 %vm3316_vm0, %v3315_v1  ;;  %2935 = vmatpush3.bf16.msra.mxu0 %v3239_v24 }
  0x15   :  { %2936 = vmatprep.subr.bf16.mxu0 %v3315_v1 }
  0x18   :  { %2937 = vmatpush3.bf16.msra.mxu0 %v3240_v25 }
  0x19   :  { %2948 = vmatprep.subr.bf16.mxu0 %v3315_v1 }
  0x1b   :  { %2939 = vmatmul.mubr.msk.bf16.vlgmr.msra.gmra.mrb[4].mxu0 %vm77_vm1, %v3399_v5 }
  0x1c   :  { %2950 = vmatprep.mubr.msk.bf16.mxu0 %vm3316_vm0, %v3315_v1 }
  0xdc   :  { %v175_v9 = vpop.f32.mrb[0].mxu1 }
  0xdd   :  { %v176_v10 = vadd.f32 %v2675_v8, %v175_v9  ;;  %v2932_v11 = vpop.f32.mrb[1].mxu1 }
  0xde   :  { %v178_v12 = vpop.f32.mrb[2].mxu1 }
  0xdf   :  { %v243_v13 = vpack.c.bf16 %v176_v10, %v176_v10  ;;  %v179_v14 = vadd.f32 %v2675_v8, %v178_v12  ;;  %v2933_v15 = vpop.f32.mrb[3].mxu1 }
  0xe1   :  { %v251_v16 = vsel %vm249_vm2, %v243_v13, 0  ;;  %v447_v33 = vpack.c.bf16 %v179_v14, %v179_v14 }
  0xe2   :  { %2943 = vmatpush3.bf16.msra.mxu1 %v251_v16 }
  0xe3   :  { %2954 = vmatprep.subr.bf16.mxu1 %v3315_v1  ;;  %v450_v35 = vsel %vm249_vm2, %v447_v33, 0 }
  0xe5   :  { %2945 = vmatmul.mubr.msk.bf16.vlgmr.msra.gmra.mrb[4].mxu1 %vm245_vm3, %v56_v17 }
  0xe6   :  { %2956 = vmatprep.mubr.msk.bf16.mxu1 %vm3316_vm0, %v3315_v1  ;;  %v115_v19 = vpop.f32.mrb[0].mxu0 }
  0xe7   :  { %v2924_v20 = vpop.f32.mrb[1].mxu0  ;;  %v116_v31 = vadd.f32 %v2671_v18, %v115_v19 }
  0xe8   :  { %v118_v21 = vpop.f32.mrb[2].mxu0 }
  0xe9   :  { %v119_v22 = vadd.f32 %v2671_v18, %v118_v21  ;;  %v2925_v23 = vpop.f32.mrb[3].mxu0  ;;  %v242_v34 = vpack.c.bf16 %v116_v31, %v116_v31 }
  0xeb   :  { %v446_v58 = vpack.c.bf16 %v119_v22, %v119_v22 }
  0xee   :  { %v235_v37 = vpop.f32.mrb[4].mxu0 }
  0xef   :  { %v236_v38 = vadd.f32 %v2679_v36, %v235_v37  ;;  %v2940_v39 = vpop.f32.mrb[5].mxu0 }
  0xf0   :  { %v238_v40 = vpop.f32.mrb[6].mxu0 }
  0xf1   :  { %v244_v41 = vpack.c.bf16 %v236_v38, %v236_v38  ;;  %v239_v42 = vadd.f32 %v2679_v36, %v238_v40  ;;  %v2941_v43 = vpop.f32.mrb[7].mxu0  ;;  %v3241_v38 = vld [vmem:[%s3841_s3 + $0x10] sm:$0xff]   ;;  %v3242_v40 = vld [vmem:[%s3841_s3 + $0x18] sm:$0xff]  }
  0xf3   :  { %v297_v44 = vsel %vm249_vm2, %v244_v41, 0  ;;  %v448_v16 = vpack.c.bf16 %v239_v42, %v239_v42  ;;  %v3243_v41 = vld [vmem:[%s3839_s1 + $0x10] sm:$0xff]   ;;  %v3244_v42 = vld [vmem:[%s3839_s1 + $0x18] sm:$0xff]  }
  0xf4   :  { %2949 = vmatpush3.bf16.msra.mxu0 %v297_v44 }
  0xf5   :  { %2960 = vmatprep.subr.bf16.mxu0 %v3315_v1  ;;  %v493_v19 = vsel %vm249_vm2, %v448_v16, 0 }
  0xf7   :  { %2951 = vmatmul.mubr.msk.bf16.vlgmr.msra.gmra.mrb[8].mxu0 %vm245_vm3, %v57_v45 }
  0xf8   :  { %2962 = vmatprep.mubr.msk.bf16.mxu0 %vm3316_vm0, %v3315_v1 }
 0x1b8   :  { %v287_v26 = vpop.f32.mrb[4].mxu1 }
 0x1b9   :  { %v339_v27 = vpack.c.bf16 %v287_v26, %v287_v26  ;;  %v2946_v28 = vpop.f32.mrb[5].mxu1 }
 0x1ba   :  { %v290_v29 = vpop.f32.mrb[6].mxu1 }
 0x1bb   :  { %v344_v30 = vsel %vm245_vm3, %v339_v27, 0  ;;  %v2947_v32 = vpop.f32.mrb[7].mxu1 }
 0x1bc   :  { %2955 = vmatpush3.bf16.xpose.msra.mxu1 %v344_v30 }
 0x1bd   :  { %2966 = vmatprep.subr.bf16.mxu1 %v3315_v1 }
 0x1c3   :  { %2957 = vmatmul.mubr.msk.bf16.vlgmr.msra.gmra.mrb[8].mxu1 %vm245_vm3, %v242_v34 }
 0x1c4   :  { %2967 = vmatpush3.bf16.msra.mxu1 %v450_v35  ;;  %2968 = vmatprep.mubr.msk.bf16.mxu1 %vm3316_vm0, %v3315_v1 }
 0x1c5   :  { %2978 = vmatprep.subr.bf16.mxu1 %v3315_v1 }
 0x1ca   :  { %v333_v0 = vpop.f32.mrb[8].mxu0 }
 0x1cb   :  { %2969 = vmatmul.mubr.msk.bf16.vlgmr.msra.gmra.mrb[12].mxu1 %vm245_vm3, %v56_v17  ;;  %v399_v2 = vpack.c.bf16 %v333_v0, %v333_v0  ;;  %v2952_v3 = vpop.f32.mrb[9].mxu0  ;;  %v3245_v0 = vld [vmem:[%s3843_s5 + $0x10] sm:$0xff]  }
 0x1cc   :  { %2980 = vmatprep.mubr.msk.bf16.mxu1 %vm3316_vm0, %v3315_v1  ;;  %v336_v4 = vpop.f32.mrb[10].mxu0 }
 0x1cd   :  { %v404_v6 = vsel %vm249_vm2, %v399_v2, 0  ;;  %v2953_v7 = vpop.f32.mrb[11].mxu0  ;;  %v3246_v2 = vld [vmem:[%s3843_s5 + $0x18] sm:$0xff]  }
 0x1ce   :  { %2961 = vmatpush3.bf16.msra.mxu0 %v404_v6 }
 0x1cf   :  { %2972 = vmatprep.subr.bf16.mxu0 %v3315_v1 }
 0x296   :  { %v380_v46 = vpop.f32.mrb[8].mxu1 }
 0x297   :  { %v386_v47 = vmul.f32 0.35355338, %v380_v46  ;;  %v2958_v48 = vpop.f32.mrb[9].mxu1 }
 0x298   :  { %v383_v49 = vpop.f32.mrb[10].mxu1  ;;  %v2712_v48 = vld [vmem:[%s3842_s4 + $0x1] ss:$0 sm:$0xff] }
 0x299   :  { %v2959_v50 = vpop.f32.mrb[11].mxu1  ;;  %v387_v51 = vsel %vm245_vm3, %v386_v47, -inf }
 0x29a   :  { %388 = vmax.xlane.f32.xlu0 %v387_v51 }
 0x29e   :  { %v486_v52 = vpop.f32.mrb[12].mxu1 }
 0x29f   :  { %v535_v53 = vpack.c.bf16 %v486_v52, %v486_v52  ;;  %v2970_v54 = vpop.f32.mrb[13].mxu1 }
 0x2a0   :  { %v489_v55 = vpop.f32.mrb[14].mxu1 }
 0x2a1   :  { %v540_v56 = vsel %vm245_vm3, %v535_v53, 0  ;;  %v2971_v57 = vpop.f32.mrb[15].mxu1 }
 0x2a2   :  { %2979 = vmatpush3.bf16.xpose.msra.mxu1 %v540_v56  ;;  %v2704_v57 = vld [vmem:[%s3845_s7 + $0x4] sm:$0xf] }
 0x2a3   :  { %2990 = vmatprep.subr.bf16.mxu1 %v3315_v1 }
 0x2a9   :  { %2981 = vmatmul.mubr.msk.bf16.vlgmr.msra.gmra.mrb[16].mxu1 %vm245_vm3, %v446_v58  ;;  %v2707_v58 = vld [vmem:[%s3840_s2 + $0x1] ss:$0 sm:$0xff] }
 0x2aa   :  { %2994 = vmatprep.mubr.msk.bf16.mxu1 %vm3316_vm0, %v3315_v1  ;;  %2991 = vmatpush3.bf16.msra.mxu1 %v3243_v41 }
 0x2ab   :  { %2992 = vmatprep.subr.bf16.mxu1 %v3315_v1 }
 0x2ae   :  { %2993 = vmatpush3.bf16.msra.mxu1 %v3244_v42 }
 0x2af   :  { %3006 = vmatprep.subr.bf16.mxu1 %v3315_v1 }
 0x2b1   :  { %2995 = vmatmul.mubr.msk.bf16.vlgmr.msra.gmra.mrb[20].mxu1 %vm77_vm1, %v3399_v5 }
 0x2b2   :  { %3010 = vmatprep.mubr.msk.bf16.mxu1 %vm3316_vm0, %v3315_v1  ;;  %3007 = vmatpush3.bf16.msra.mxu1 %v3245_v0 }
 0x2b3   :  { %3008 = vmatprep.subr.bf16.mxu1 %v3315_v1 }
 0x2b6   :  { %3009 = vmatpush3.bf16.msra.mxu1 %v3246_v2 }
 0x2b7   :  { %3020 = vmatprep.subr.bf16.mxu1 %v3315_v1 }
 0x2b9   :  { %3011 = vmatmul.mubr.msk.bf16.vlgmr.msra.gmra.mrb[24].mxu1 %vm77_vm1, %v3399_v5 }
 0x2ba   :  { %3022 = vmatprep.mubr.msk.bf16.mxu1 %vm3316_vm0, %v3315_v1 }
 0x327   :  { %v389_v59 = vpop.xlane.xlu0 %388 }
 0x328   :  { %v390_v60 = vsub.f32 %v386_v47, %v389_v59 }
 0x32a   :  { %v391_v61 = vmul.f32 1.442695, %v390_v60 }
 0x32c   :  { %3259 = vpow2.f32 %v391_v61 }
 0x336   :  { %v3260_v62 = vpop.eup %3259 }
 0x337   :  { %v393_v63 = vsel %vm245_vm3, %v3260_v62, 0.0 }
 0x338   :  { %394 = vadd.xlane.f32.xlu0 %v393_v63 }
 0x37c   :  { %v576_v8 = vpop.f32.mrb[16].mxu1 }
 0x37d   :  { %v582_v9 = vmul.f32 0.35355338, %v576_v8  ;;  %v2982_v10 = vpop.f32.mrb[17].mxu1 }
 0x37e   :  { %v579_v11 = vpop.f32.mrb[18].mxu1 }
 0x37f   :  { %v2983_v12 = vpop.f32.mrb[19].mxu1  ;;  %v583_v13 = vsel %vm245_vm3, %v582_v9, -inf }
 0x380   :  { %584 = vmax.xlane.f32.xlu1 %v583_v13 }
 0x384   :  { %v718_v59 = vpop.f32.mrb[20].mxu1 }
 0x385   :  { %v2996_v60 = vpop.f32.mrb[21].mxu1 }
 0x386   :  { %v721_v61 = vpop.f32.mrb[22].mxu1 }
 0x387   :  { %v2997_v63 = vpop.f32.mrb[23].mxu1 }
 0x3c5   :  { %v395_v14 = vpop.xlane.xlu0 %394 }
 0x3c6   :  { %3261 = vrcp.f32 %v395_v14  ;;  %v2717_v14 = vld [vmem:[%s3844_s6 + $0x1] ss:$0 sm:$0xff] }
 0x3d0   :  { %v3262_v15 = vpop.eup %3261 }
 0x3d1   :  { %v397_v17 = vmul.f32 %v3262_v15, %v3260_v62  ;;  %v722_v62 = vadd.f32 %v2707_v58, %v721_v61  ;;  %v840_v15 = vpop.f32.mrb[24].mxu1 }
 0x3d2   :  { %v841_v16 = vadd.f32 %v2717_v14, %v840_v15 }
 0x3d3   :  { %v398_v18 = vpack.c.bf16 %v397_v17, %v397_v17  ;;  %v3012_v17 = vpop.f32.mrb[25].mxu1 }
 0x3d5   :  { %2963 = vmatmul.mubr.msk.bf16.vlgmr.msra.gmra.mrb[12].mxu0 %vm245_vm3, %v398_v18  ;;  %v843_v18 = vpop.f32.mrb[26].mxu1 }
 0x3d6   :  { %2973 = vmatpush3.bf16.msra.mxu0 %v493_v19  ;;  %2974 = vmatprep.mubr.msk.bf16.mxu0 %vm3316_vm0, %v3315_v1  ;;  %v849_v19 = vpack.c.bf16 %v841_v16, %v841_v16 }
 0x3d7   :  { %2984 = vmatprep.subr.bf16.mxu0 %v3315_v1 }
 0x3dd   :  { %2975 = vmatmul.mubr.msk.bf16.vlgmr.msra.gmra.mrb[16].mxu0 %vm245_vm3, %v57_v45 }
 0x3de   :  { %2986 = vmatprep.mubr.msk.bf16.mxu0 %vm3316_vm0, %v3315_v1 }
 0x40d   :  { %v585_v20 = vpop.xlane.xlu1 %584 }
 0x40e   :  { %v586_v21 = vsub.f32 %v582_v9, %v585_v20  ;;  %v719_v9 = vadd.f32 %v2707_v58, %v718_v59  ;;  %v844_v20 = vadd.f32 %v2717_v14, %v843_v18  ;;  %v55_v18 = vld [vmem:[%s3847_s9] sm:$0xf] }
 0x410   :  { %v587_v22 = vmul.f32 1.442695, %v586_v21  ;;  %v847_v12 = vpack.c.bf16 %v719_v9, %v719_v9  ;;  %v3013_v21 = vpop.f32.mrb[27].mxu1  ;;  %v1051_v59 = vpack.c.bf16 %v844_v20, %v844_v20 }
 0x411   :  { %v1297_v21 = vsel %vm249_vm2, %v55_v18, 0  ;;  %v2745_v18 = vld [vmem:[%s3846_s8 + $0x8] sm:$0xf] }
 0x412   :  { %3263 = vpow2.f32 %v587_v22  ;;  %v900_v22 = vsel %vm249_vm2, %v849_v19, 0 }
 0x413   :  { %3021 = vmatpush3.bf16.msra.mxu1 %v900_v22  ;;  %v3247_v22 = vld [vmem:[%s3841_s3 + $0x20] sm:$0xff]  }
 0x414   :  { %3032 = vmatprep.subr.bf16.mxu1 %v3315_v1 }
 0x41c   :  { %v3264_v23 = vpop.eup %3263 }
 0x41d   :  { %v589_v24 = vsel %vm245_vm3, %v3264_v23, 0.0 }
 0x41e   :  { %590 = vadd.xlane.f32.xlu1 %v589_v24 }
 0x4a8   :  { %v3484_v25 = vpop.f32.mrb[12].mxu0 }
 0x4a9   :  { %v2964_v26 = vpop.f32.mrb[13].mxu0 }
 0x4aa   :  { %v443_v27 = vpop.f32.mrb[14].mxu0 }
 0x4ab   :  { %v591_v28 = vpop.xlane.xlu1 %590  ;;  %v2965_v29 = vpop.f32.mrb[15].mxu0 }
 0x4ac   :  { %3265 = vrcp.f32 %v591_v28 }
 0x4b0   :  { %v529_v30 = vpop.f32.mrb[16].mxu0 }
 0x4b1   :  { %v595_v31 = vpack.c.bf16 %v529_v30, %v529_v30  ;;  %v2976_v32 = vpop.f32.mrb[17].mxu0 }
 0x4b2   :  { %v532_v33 = vpop.f32.mrb[18].mxu0 }
 0x4b3   :  { %v600_v34 = vsel %vm249_vm2, %v595_v31, 0  ;;  %v2977_v35 = vpop.f32.mrb[19].mxu0 }
 0x4b4   :  { %2985 = vmatpush3.bf16.msra.mxu0 %v600_v34 }
 0x4b5   :  { %2998 = vmatprep.subr.bf16.mxu0 %v3315_v1 }
 0x4b6   :  { %v3266_v36 = vpop.eup %3265 }
 0x4b7   :  { %v593_v37 = vmul.f32 %v3266_v36, %v3264_v23  ;;  %v2705_v23 = vld [vmem:[%s3846_s8 + $0x4] sm:$0xf] }
 0x4b8   :  { %3023 = vmatmul.mubr.msk.bf16.vlgmr.msra.gmra.mrb[28].mxu1 %vm245_vm3, %v2705_v23 }
 0x4b9   :  { %v594_v39 = vpack.c.bf16 %v593_v37, %v593_v37  ;;  %3034 = vmatprep.mubr.msk.bf16.mxu1 %vm3316_vm0, %v3315_v1  ;;  %v1049_v37 = vpack.c.bf16 %v722_v62, %v722_v62  ;;  %v1096_v62 = vsel %vm249_vm2, %v1051_v59, 0 }
 0x4bb   :  { %2987 = vmatmul.mubr.msk.bf16.vlgmr.msra.gmra.mrb[20].mxu0 %vm245_vm3, %v594_v39 }
 0x4bc   :  { %2999 = vmatpush3.bf16.msra.mxu0 %v3241_v38  ;;  %3002 = vmatprep.mubr.msk.bf16.mxu0 %vm3316_vm0, %v3315_v1 }
 0x4bd   :  { %3000 = vmatprep.subr.bf16.mxu0 %v3315_v1 }
 0x4c0   :  { %3001 = vmatpush3.bf16.msra.mxu0 %v3242_v40 }
 0x4c1   :  { %3014 = vmatprep.subr.bf16.mxu0 %v3315_v1 }
 0x4c3   :  { %3003 = vmatmul.mubr.msk.bf16.vlgmr.msra.gmra.mrb[24].mxu0 %vm77_vm1, %v3399_v5 }
 0x4c4   :  { %3016 = vmatprep.mubr.msk.bf16.mxu0 %vm3316_vm0, %v3315_v1 }
 0x58e   :  { %v3515_v43 = vpop.f32.mrb[20].mxu0 }
 0x58f   :  { %v642_v44 = vpack.c.bf16 %v3515_v43, %v3484_v25  ;;  %v2988_v45 = vpop.f32.mrb[21].mxu0  ;;  %v2703_v25 = vld [vmem:[%s3847_s9 + $0x4] sm:$0xf] }
 0x590   :  { %v639_v46 = vpop.f32.mrb[22].mxu0  ;;  %v936_v45 = vpop.f32.mrb[28].mxu1  ;;  %v1250_v43 = vsel %vm249_vm2, %v2703_v25, 0 }
 0x591   :  { %v2989_v47 = vpop.f32.mrb[23].mxu0  ;;  %v1002_v46 = vpack.c.bf16 %v936_v45, %v936_v45 }
 0x592   :  { %v3024_v47 = vpop.f32.mrb[29].mxu1 }
 0x593   :  { %v3251_v47 = vld [vmem:[%s3843_s5 + $0x20] sm:$0xff]  }
 0x596   :  { %v779_v49 = vpop.f32.mrb[24].mxu0 }
 0x597   :  { %v780_v50 = vadd.f32 %v2712_v48, %v779_v49  ;;  %v3004_v51 = vpop.f32.mrb[25].mxu0  ;;  %v1007_v49 = vsel %vm249_vm2, %v1002_v46, 0  ;;  %v2744_v46 = vld [vmem:[%s3845_s7 + $0x8] sm:$0xf] }
 0x598   :  { %v782_v52 = vpop.f32.mrb[26].mxu0  ;;  %3033 = vmatpush3.bf16.msra.mxu1 %v1007_v49 }
 0x599   :  { %v848_v53 = vpack.c.bf16 %v780_v50, %v780_v50  ;;  %v783_v54 = vadd.f32 %v2712_v48, %v782_v52  ;;  %v3005_v55 = vpop.f32.mrb[27].mxu0  ;;  %v939_v48 = vpop.f32.mrb[30].mxu1  ;;  %3044 = vmatprep.subr.bf16.mxu1 %v3315_v1 }
 0x59a   :  { %v3025_v50 = vpop.f32.mrb[31].mxu1  ;;  %v3252_v48 = vld [vmem:[%s3843_s5 + $0x28] sm:$0xff]  }
 0x59b   :  { %v854_v56 = vsel %vm249_vm2, %v848_v53, 0  ;;  %v1050_v11 = vpack.c.bf16 %v783_v54, %v783_v54 }
 0x59c   :  { %3015 = vmatpush3.bf16.msra.mxu0 %v854_v56 }
 0x59d   :  { %3026 = vmatprep.subr.bf16.mxu0 %v3315_v1  ;;  %v1053_v13 = vsel %vm249_vm2, %v1050_v11, 0 }
 0x59f   :  { %3017 = vmatmul.mubr.msk.bf16.vlgmr.msra.gmra.mrb[28].mxu0 %vm245_vm3, %v2704_v57 }
 0x5a0   :  { %3028 = vmatprep.mubr.msk.bf16.mxu0 %vm3316_vm0, %v3315_v1 }
 0x672   :  { %v890_v3 = vpop.f32.mrb[28].mxu0 }
 0x673   :  { %v942_v4 = vpack.c.bf16 %v890_v3, %v890_v3  ;;  %v3018_v6 = vpop.f32.mrb[29].mxu0 }
 0x674   :  { %v893_v7 = vpop.f32.mrb[30].mxu0 }
 0x675   :  { %v947_v8 = vsel %vm245_vm3, %v942_v4, 0  ;;  %v3019_v10 = vpop.f32.mrb[31].mxu0 }
 0x676   :  { %3027 = vmatpush3.bf16.xpose.msra.mxu0 %v947_v8 }
 0x677   :  { %3038 = vmatprep.subr.bf16.mxu0 %v3315_v1 }
 0x67d   :  { %3029 = vmatmul.mubr.msk.bf16.vlgmr.msra.gmra.mrb[32].mxu0 %vm245_vm3, %v847_v12 }
 0x67e   :  { %3039 = vmatpush3.bf16.msra.mxu0 %v1053_v13  ;;  %3040 = vmatprep.mubr.msk.bf16.mxu0 %vm3316_vm0, %v3315_v1 }
 0x67f   :  { %3050 = vmatprep.subr.bf16.mxu0 %v3315_v1 }
 0x685   :  { %3041 = vmatmul.mubr.msk.bf16.vlgmr.msra.gmra.mrb[36].mxu0 %vm245_vm3, %v2704_v57 }
 0x686   :  { %3052 = vmatprep.mubr.msk.bf16.mxu0 %vm3316_vm0, %v3315_v1 }
 0x750   :  { %v983_v24 = vpop.f32.mrb[32].mxu0 }
 0x751   :  { %v989_v26 = vmul.f32 0.35355338, %v983_v24  ;;  %v3030_v27 = vpop.f32.mrb[33].mxu0  ;;  %v3249_v24 = vld [vmem:[%s3839_s1 + $0x20] sm:$0xff]  }
 0x752   :  { %v986_v28 = vpop.f32.mrb[34].mxu0 }
 0x753   :  { %v3031_v29 = vpop.f32.mrb[35].mxu0  ;;  %v990_v30 = vsel %vm245_vm3, %v989_v26, -inf }
 0x754   :  { %991 = vmax.xlane.f32.xlu0 %v990_v30  ;;  %v3250_v30 = vld [vmem:[%s3839_s1 + $0x28] sm:$0xff]  }
 0x758   :  { %v1089_v31 = vpop.f32.mrb[36].mxu0 }
 0x759   :  { %v1138_v32 = vpack.c.bf16 %v1089_v31, %v1089_v31  ;;  %v3042_v33 = vpop.f32.mrb[37].mxu0 }
 0x75a   :  { %v1092_v34 = vpop.f32.mrb[38].mxu0 }
 0x75b   :  { %v1143_v35 = vsel %vm245_vm3, %v1138_v32, 0  ;;  %v3043_v36 = vpop.f32.mrb[39].mxu0 }
 0x75c   :  { %3051 = vmatpush3.bf16.xpose.msra.mxu0 %v1143_v35  ;;  %v2752_v35 = vld [vmem:[%s3842_s4 + $0x2] ss:$0 sm:$0xff] }
 0x75d   :  { %3062 = vmatprep.subr.bf16.mxu0 %v3315_v1 }
 0x763   :  { %3053 = vmatmul.mubr.msk.bf16.vlgmr.msra.gmra.mrb[40].mxu0 %vm245_vm3, %v1049_v37 }
 0x764   :  { %3064 = vmatprep.mubr.msk.bf16.mxu0 %vm3316_vm0, %v3315_v1  ;;  %3063 = vmatpush3.bf16.msra.mxu0 %v1250_v43 }
 0x765   :  { %3074 = vmatprep.subr.bf16.mxu0 %v3315_v1 }
 0x7e1   :  { %v992_v38 = vpop.xlane.xlu0 %991 }
 0x7e2   :  { %v993_v39 = vsub.f32 %v989_v26, %v992_v38 }
 0x7e4   :  { %v994_v40 = vmul.f32 1.442695, %v993_v39 }
 0x7e6   :  { %3267 = vpow2.f32 %v994_v40 }
 0x7f0   :  { %v3268_v41 = vpop.eup %3267 }
 0x7f1   :  { %v996_v42 = vsel %vm245_vm3, %v3268_v41, 0.0 }
 0x7f2   :  { %997 = vadd.xlane.f32.xlu1 %v996_v42 }
 0x836   :  { %v1179_v51 = vpop.f32.mrb[40].mxu0 }
 0x837   :  { %v1185_v52 = vmul.f32 0.35355338, %v1179_v51  ;;  %v3054_v53 = vpop.f32.mrb[41].mxu0 }
 0x838   :  { %v1182_v54 = vpop.f32.mrb[42].mxu0 }
 0x839   :  { %v3055_v55 = vpop.f32.mrb[43].mxu0  ;;  %v1186_v56 = vsel %vm245_vm3, %v1185_v52, -inf }
 0x83a   :  { %1187 = vmax.xlane.f32.xlu0 %v1186_v56  ;;  %v2747_v55 = vld [vmem:[%s3840_s2 + $0x2] ss:$0 sm:$0xff] }
 0x87f   :  { %v998_v57 = vpop.xlane.xlu1 %997 }
 0x880   :  { %3269 = vrcp.f32 %v998_v57 }
 0x88a   :  { %v3270_v58 = vpop.eup %3269 }
 0x88b   :  { %v1000_v60 = vmul.f32 %v3270_v58, %v3268_v41 }
 0x88d   :  { %v1001_v61 = vpack.c.bf16 %v1000_v60, %v1000_v60 }
 0x88f   :  { %3035 = vmatmul.mubr.msk.bf16.vlgmr.msra.gmra.mrb[32].mxu1 %vm245_vm3, %v1001_v61 }
 0x890   :  { %3045 = vmatpush3.bf16.msra.mxu1 %v1096_v62  ;;  %3046 = vmatprep.mubr.msk.bf16.mxu1 %vm3316_vm0, %v3315_v1 }
 0x891   :  { %3056 = vmatprep.subr.bf16.mxu1 %v3315_v1 }
 0x897   :  { %3047 = vmatmul.mubr.msk.bf16.vlgmr.msra.gmra.mrb[36].mxu1 %vm245_vm3, %v2705_v23  ;;  %v3248_v23 = vld [vmem:[%s3841_s3 + $0x28] sm:$0xff]  }
 0x898   :  { %3058 = vmatprep.mubr.msk.bf16.mxu1 %vm3316_vm0, %v3315_v1 }
 0x8c7   :  { %v1188_v63 = vpop.xlane.xlu0 %1187 }
 0x8c8   :  { %v1189_v0 = vsub.f32 %v1185_v52, %v1188_v63 }
 0x8ca   :  { %v1190_v2 = vmul.f32 1.442695, %v1189_v0 }
 0x8cc   :  { %3271 = vpow2.f32 %v1190_v2 }
 0x8d6   :  { %v3272_v3 = vpop.eup %3271 }
 0x8d7   :  { %v1192_v4 = vsel %vm245_vm3, %v3272_v3, 0.0 }
 0x8d8   :  { %1193 = vadd.xlane.f32.xlu1 %v1192_v4 }
 0x962   :  { %v1043_v6 = vpop.f32.mrb[32].mxu1 }
 0x963   :  { %v3036_v7 = vpop.f32.mrb[33].mxu1 }
 0x964   :  { %v1046_v8 = vpop.f32.mrb[34].mxu1 }
 0x965   :  { %v3037_v9 = vpop.f32.mrb[35].mxu1  ;;  %v1194_v10 = vpop.xlane.xlu1 %1193 }
 0x966   :  { %3273 = vrcp.f32 %v1194_v10  ;;  %v2757_v9 = vld [vmem:[%s3844_s6 + $0x2] ss:$0 sm:$0xff] }
 0x96a   :  { %v1132_v11 = vpop.f32.mrb[36].mxu1 }
 0x96b   :  { %v1198_v12 = vpack.c.bf16 %v1132_v11, %v1132_v11  ;;  %v3048_v13 = vpop.f32.mrb[37].mxu1 }
 0x96c   :  { %v1135_v14 = vpop.f32.mrb[38].mxu1 }
 0x96d   :  { %v1203_v15 = vsel %vm249_vm2, %v1198_v12, 0  ;;  %v3049_v16 = vpop.f32.mrb[39].mxu1 }
 0x96e   :  { %3057 = vmatpush3.bf16.msra.mxu1 %v1203_v15 }
 0x96f   :  { %3068 = vmatprep.subr.bf16.mxu1 %v3315_v1 }
 0x970   :  { %v3274_v17 = vpop.eup %3273 }
 0x971   :  { %v1196_v19 = vmul.f32 %v3274_v17, %v3272_v3 }
 0x973   :  { %v1197_v20 = vpack.c.bf16 %v1196_v19, %v1196_v19 }
 0x975   :  { %3059 = vmatmul.mubr.msk.bf16.vlgmr.msra.gmra.mrb[40].mxu1 %vm245_vm3, %v1197_v20 }
 0x976   :  { %3069 = vmatpush3.bf16.msra.mxu1 %v1297_v21  ;;  %3070 = vmatprep.mubr.msk.bf16.mxu1 %vm3316_vm0, %v3315_v1 }
 0x977   :  { %3082 = vmatprep.subr.bf16.mxu1 %v3315_v1 }
 0x97d   :  { %3071 = vmatmul.mubr.msk.bf16.vlgmr.msra.gmra.mrb[44].mxu1 %vm245_vm3, %v642_v44 }
 0x97e   :  { %3083 = vmatpush3.bf16.msra.mxu1 %v3247_v22  ;;  %3086 = vmatprep.mubr.msk.bf16.mxu1 %vm3316_vm0, %v3315_v1 }
 0x97f   :  { %3084 = vmatprep.subr.bf16.mxu1 %v3315_v1 }
 0x982   :  { %3085 = vmatpush3.bf16.msra.mxu1 %v3248_v23 }
 0x983   :  { %3098 = vmatprep.subr.bf16.mxu1 %v3315_v1 }
 0x985   :  { %3087 = vmatmul.mubr.msk.bf16.vlgmr.msra.gmra.mrb[48].mxu1 %vm77_vm1, %v3399_v5 }
 0x986   :  { %3100 = vmatprep.mubr.msk.bf16.mxu1 %vm3316_vm0, %v3315_v1 }
 0xa48   :  { %v1239_v44 = vpop.f32.mrb[40].mxu1 }
 0xa49   :  { %v1245_v26 = vpack.c.bf16 %v1239_v44, %v1043_v6  ;;  %v3060_v27 = vpop.f32.mrb[41].mxu1 }
 0xa4a   :  { %v1242_v28 = vpop.f32.mrb[42].mxu1 }
 0xa4b   :  { %v3061_v29 = vpop.f32.mrb[43].mxu1  ;;  %3065 = vmatmul.mubr.msk.bf16.vlgmr.msra.gmra.mrb[44].mxu0 %vm245_vm3, %v1245_v26 }
 0xa4c   :  { %3075 = vmatpush3.bf16.msra.mxu0 %v3249_v24  ;;  %3078 = vmatprep.mubr.msk.bf16.mxu0 %vm3316_vm0, %v3315_v1 }
 0xa4d   :  { %3076 = vmatprep.subr.bf16.mxu0 %v3315_v1 }
 0xa50   :  { %v1333_v31 = vpop.f32.mrb[44].mxu1  ;;  %3077 = vmatpush3.bf16.msra.mxu0 %v3250_v30 }
 0xa51   :  { %v3072_v32 = vpop.f32.mrb[45].mxu1  ;;  %3090 = vmatprep.subr.bf16.mxu0 %v3315_v1 }
 0xa52   :  { %v1336_v33 = vpop.f32.mrb[46].mxu1 }
 0xa53   :  { %v3073_v34 = vpop.f32.mrb[47].mxu1  ;;  %3079 = vmatmul.mubr.msk.bf16.vlgmr.msra.gmra.mrb[48].mxu0 %vm77_vm1, %v3399_v5 }
 0xa54   :  { %3094 = vmatprep.mubr.msk.bf16.mxu0 %vm3316_vm0, %v3315_v1  ;;  %3091 = vmatpush3.bf16.msra.mxu0 %v3251_v47 }
 0xa55   :  { %3092 = vmatprep.subr.bf16.mxu0 %v3315_v1 }
 0xa58   :  { %v1476_v36 = vpop.f32.mrb[48].mxu1  ;;  %3093 = vmatpush3.bf16.msra.mxu0 %v3252_v48 }
 0xa59   :  { %v1477_v37 = vadd.f32 %v2752_v35, %v1476_v36  ;;  %v3088_v38 = vpop.f32.mrb[49].mxu1  ;;  %3104 = vmatprep.subr.bf16.mxu0 %v3315_v1 }
 0xa5a   :  { %v1479_v39 = vpop.f32.mrb[50].mxu1 }
 0xa5b   :  { %v1545_v40 = vpack.c.bf16 %v1477_v37, %v1477_v37  ;;  %v1480_v41 = vadd.f32 %v2752_v35, %v1479_v39  ;;  %v3089_v42 = vpop.f32.mrb[51].mxu1  ;;  %3095 = vmatmul.mubr.msk.bf16.vlgmr.msra.gmra.mrb[52].mxu0 %vm77_vm1, %v3399_v5 }
 0xa5c   :  { %3106 = vmatprep.mubr.msk.bf16.mxu0 %vm3316_vm0, %v3315_v1 }
 0xa5d   :  { %v1551_v45 = vsel %vm249_vm2, %v1545_v40, 0  ;;  %v1747_v6 = vpack.c.bf16 %v1480_v41, %v1480_v41 }
 0xa5e   :  { %3099 = vmatpush3.bf16.msra.mxu1 %v1551_v45 }
 0xa5f   :  { %3110 = vmatprep.subr.bf16.mxu1 %v3315_v1  ;;  %v1750_v8 = vsel %vm249_vm2, %v1747_v6, 0 }
 0xa61   :  { %3101 = vmatmul.mubr.msk.bf16.vlgmr.msra.gmra.mrb[52].mxu1 %vm245_vm3, %v2744_v46 }
 0xa62   :  { %3112 = vmatprep.mubr.msk.bf16.mxu1 %vm3316_vm0, %v3315_v1 }
 0xb1e   :  { %v1286_v49 = vpop.f32.mrb[44].mxu0 }
 0xb1f   :  { %v3656_v50 = vadd.f32 %v1333_v31, %v1286_v49  ;;  %v3066_v51 = vpop.f32.mrb[45].mxu0 }
 0xb20   :  { %v1289_v52 = vpop.f32.mrb[46].mxu0 }
 0xb21   :  { %v3658_v53 = vadd.f32 %v1336_v33, %v1289_v52  ;;  %v3067_v54 = vpop.f32.mrb[47].mxu0 }
 0xb26   :  { %v1415_v56 = vpop.f32.mrb[48].mxu0 }
 0xb27   :  { %v3080_v57 = vpop.f32.mrb[49].mxu0  ;;  %v1416_v3 = vadd.f32 %v2747_v55, %v1415_v56 }
 0xb28   :  { %v1418_v58 = vpop.f32.mrb[50].mxu0 }
 0xb29   :  { %v1419_v59 = vadd.f32 %v2747_v55, %v1418_v58  ;;  %v3081_v60 = vpop.f32.mrb[51].mxu0  ;;  %v1544_v7 = vpack.c.bf16 %v1416_v3, %v1416_v3 }
 0xb2b   :  { %v1746_v29 = vpack.c.bf16 %v1419_v59, %v1419_v59 }
 0xb2e   :  { %v1537_v10 = vpop.f32.mrb[52].mxu0 }
 0xb2f   :  { %v1538_v11 = vadd.f32 %v2757_v9, %v1537_v10  ;;  %v3096_v12 = vpop.f32.mrb[53].mxu0 }
 0xb30   :  { %v1540_v13 = vpop.f32.mrb[54].mxu0 }
 0xb31   :  { %v1546_v14 = vpack.c.bf16 %v1538_v11, %v1538_v11  ;;  %v1541_v15 = vadd.f32 %v2757_v9, %v1540_v13  ;;  %v3097_v16 = vpop.f32.mrb[55].mxu0 }
 0xb33   :  { %v1597_v17 = vsel %vm249_vm2, %v1546_v14, 0  ;;  %v1748_v52 = vpack.c.bf16 %v1541_v15, %v1541_v15  ;;  %v2743_v14 = vld [vmem:[%s3847_s9 + $0x8] sm:$0xf] }
 0xb34   :  { %v1587_v61 = vpop.f32.mrb[52].mxu1  ;;  %3105 = vmatpush3.bf16.msra.mxu0 %v1597_v17  ;;  %v1947_v15 = vsel %vm249_vm2, %v2743_v14, 0  ;;  %v3253_v17 = vld [vmem:[%s3841_s3 + $0x30] sm:$0xff]  }
 0xb35   :  { %v1639_v62 = vpack.c.bf16 %v1587_v61, %v1587_v61  ;;  %v3102_v63 = vpop.f32.mrb[53].mxu1  ;;  %3116 = vmatprep.subr.bf16.mxu0 %v3315_v1  ;;  %v1793_v56 = vsel %vm249_vm2, %v1748_v52, 0 }
 0xb36   :  { %v1590_v0 = vpop.f32.mrb[54].mxu1 }
 0xb37   :  { %v1644_v2 = vsel %vm245_vm3, %v1639_v62, 0  ;;  %v3103_v4 = vpop.f32.mrb[55].mxu1  ;;  %3107 = vmatmul.mubr.msk.bf16.vlgmr.msra.gmra.mrb[56].mxu0 %vm245_vm3, %v2745_v18 }
 0xb38   :  { %3111 = vmatpush3.bf16.xpose.msra.mxu1 %v1644_v2  ;;  %3118 = vmatprep.mubr.msk.bf16.mxu0 %vm3316_vm0, %v3315_v1 }
 0xb39   :  { %3122 = vmatprep.subr.bf16.mxu1 %v3315_v1 }
 0xb3f   :  { %3113 = vmatmul.mubr.msk.bf16.vlgmr.msra.gmra.mrb[56].mxu1 %vm245_vm3, %v1544_v7 }
 0xb40   :  { %3123 = vmatpush3.bf16.msra.mxu1 %v1750_v8  ;;  %3124 = vmatprep.mubr.msk.bf16.mxu1 %vm3316_vm0, %v3315_v1 }
 0xb41   :  { %3134 = vmatprep.subr.bf16.mxu1 %v3315_v1 }
 0xb47   :  { %3125 = vmatmul.mubr.msk.bf16.vlgmr.msra.gmra.mrb[60].mxu1 %vm245_vm3, %v2744_v46 }
 0xb48   :  { %3136 = vmatprep.mubr.msk.bf16.mxu1 %vm3316_vm0, %v3315_v1 }
 0xc0a   :  { %v1633_v35 = vpop.f32.mrb[56].mxu0 }
 0xc0b   :  { %v1699_v36 = vpack.c.bf16 %v1633_v35, %v1633_v35  ;;  %v3108_v37 = vpop.f32.mrb[57].mxu0 }
 0xc0c   :  { %v1636_v38 = vpop.f32.mrb[58].mxu0  ;;  %v2786_v37 = vld [vmem:[%s3840_s2 + $0x3] ss:$0 sm:$0xff] }
 0xc0d   :  { %v1704_v39 = vsel %vm249_vm2, %v1699_v36, 0  ;;  %v3109_v40 = vpop.f32.mrb[59].mxu0 }
 0xc0e   :  { %3117 = vmatpush3.bf16.msra.mxu0 %v1704_v39 }
 0xc0f   :  { %3128 = vmatprep.subr.bf16.mxu0 %v3315_v1 }
 0xc12   :  { %v1680_v19 = vpop.f32.mrb[56].mxu1 }
 0xc13   :  { %v1686_v20 = vmul.f32 0.35355338, %v1680_v19  ;;  %v3114_v21 = vpop.f32.mrb[57].mxu1 }
 0xc14   :  { %v1683_v22 = vpop.f32.mrb[58].mxu1 }
 0xc15   :  { %v3115_v23 = vpop.f32.mrb[59].mxu1  ;;  %v1687_v25 = vsel %vm245_vm3, %v1686_v20, -inf  ;;  %v3254_v22 = vld [vmem:[%s3841_s3 + $0x38] sm:$0xff]  }
 0xc16   :  { %1688 = vmax.xlane.f32.xlu0 %v1687_v25  ;;  %v3255_v23 = vld [vmem:[%s3839_s1 + $0x30] sm:$0xff]   ;;  %v3256_v25 = vld [vmem:[%s3839_s1 + $0x38] sm:$0xff]  }
 0xc1a   :  { %v1786_v43 = vpop.f32.mrb[60].mxu1 }
 0xc1b   :  { %v1835_v44 = vpack.c.bf16 %v1786_v43, %v1786_v43  ;;  %v3126_v24 = vpop.f32.mrb[61].mxu1 }
 0xc1c   :  { %v1789_v26 = vpop.f32.mrb[62].mxu1 }
 0xc1d   :  { %v1840_v27 = vsel %vm245_vm3, %v1835_v44, 0  ;;  %v3127_v28 = vpop.f32.mrb[63].mxu1 }
 0xc1e   :  { %3135 = vmatpush3.bf16.xpose.msra.mxu1 %v1840_v27 }
 0xc1f   :  { %3146 = vmatprep.subr.bf16.mxu1 %v3315_v1 }
 0xc25   :  { %3137 = vmatmul.mubr.msk.bf16.vlgmr.msra.gmra.mrb[64].mxu1 %vm245_vm3, %v1746_v29  ;;  %v2791_v29 = vld [vmem:[%s3842_s4 + $0x3] ss:$0 sm:$0xff] }
 0xc26   :  { %3148 = vmatprep.mubr.msk.bf16.mxu1 %vm3316_vm0, %v3315_v1  ;;  %3147 = vmatpush3.bf16.msra.mxu1 %v1947_v15 }
 0xc27   :  { %3160 = vmatprep.subr.bf16.mxu1 %v3315_v1 }
 0xca3   :  { %v1689_v30 = vpop.xlane.xlu0 %1688 }
 0xca4   :  { %v1690_v31 = vsub.f32 %v1686_v20, %v1689_v30 }
 0xca6   :  { %v1691_v32 = vmul.f32 1.442695, %v1690_v31 }
 0xca8   :  { %3275 = vpow2.f32 %v1691_v32 }
 0xcb2   :  { %v3276_v33 = vpop.eup %3275 }
 0xcb3   :  { %v1693_v34 = vsel %vm245_vm3, %v3276_v33, 0.0 }
 0xcb4   :  { %1694 = vadd.xlane.f32.xlu1 %v1693_v34 }
 0xcf8   :  { %v1876_v41 = vpop.f32.mrb[64].mxu1 }
 0xcf9   :  { %v1882_v42 = vmul.f32 0.35355338, %v1876_v41  ;;  %v3138_v45 = vpop.f32.mrb[65].mxu1 }
 0xcfa   :  { %v1879_v46 = vpop.f32.mrb[66].mxu1  ;;  %v3257_v45 = vld [vmem:[%s3843_s5 + $0x30] sm:$0xff]  }
 0xcfb   :  { %v3139_v47 = vpop.f32.mrb[67].mxu1  ;;  %v1883_v48 = vsel %vm245_vm3, %v1882_v42, -inf  ;;  %v3258_v46 = vld [vmem:[%s3843_s5 + $0x38] sm:$0xff]  }
 0xcfc   :  { %1884 = vmax.xlane.f32.xlu0 %v1883_v48 }
 0xd41   :  { %v1695_v49 = vpop.xlane.xlu1 %1694 }
 0xd42   :  { %3277 = vrcp.f32 %v1695_v49 }
 0xd4c   :  { %v3278_v51 = vpop.eup %3277 }
 0xd4d   :  { %v1697_v54 = vmul.f32 %v3278_v51, %v3276_v33 }
 0xd4f   :  { %v1698_v55 = vpack.c.bf16 %v1697_v54, %v1697_v54 }
 0xd51   :  { %3119 = vmatmul.mubr.msk.bf16.vlgmr.msra.gmra.mrb[60].mxu0 %vm245_vm3, %v1698_v55 }
 0xd52   :  { %3129 = vmatpush3.bf16.msra.mxu0 %v1793_v56  ;;  %3130 = vmatprep.mubr.msk.bf16.mxu0 %vm3316_vm0, %v3315_v1 }
 0xd53   :  { %3140 = vmatprep.subr.bf16.mxu0 %v3315_v1 }
 0xd59   :  { %3131 = vmatmul.mubr.msk.bf16.vlgmr.msra.gmra.mrb[64].mxu0 %vm245_vm3, %v2745_v18 }
 0xd5a   :  { %3142 = vmatprep.mubr.msk.bf16.mxu0 %vm3316_vm0, %v3315_v1 }
 0xd89   :  { %v1885_v57 = vpop.xlane.xlu0 %1884 }
 0xd8a   :  { %v1886_v58 = vsub.f32 %v1882_v42, %v1885_v57 }
 0xd8c   :  { %v1887_v59 = vmul.f32 1.442695, %v1886_v58 }
 0xd8e   :  { %3279 = vpow2.f32 %v1887_v59 }
 0xd98   :  { %v3280_v60 = vpop.eup %3279 }
 0xd99   :  { %v1889_v61 = vsel %vm245_vm3, %v3280_v60, 0.0 }
 0xd9a   :  { %1890 = vadd.xlane.f32.xlu1 %v1889_v61 }
 0xe24   :  { %v1740_v62 = vpop.f32.mrb[60].mxu0 }
 0xe25   :  { %v3120_v63 = vpop.f32.mrb[61].mxu0 }
 0xe26   :  { %v1743_v0 = vpop.f32.mrb[62].mxu0 }
 0xe27   :  { %v1891_v2 = vpop.xlane.xlu1 %1890  ;;  %v3121_v3 = vpop.f32.mrb[63].mxu0 }
 0xe28   :  { %3281 = vrcp.f32 %v1891_v2 }
 0xe2c   :  { %v1829_v4 = vpop.f32.mrb[64].mxu0 }
 0xe2d   :  { %v1895_v6 = vpack.c.bf16 %v1829_v4, %v1829_v4  ;;  %v3132_v7 = vpop.f32.mrb[65].mxu0  ;;  %v2784_v4 = vld [vmem:[%s3846_s8 + $0xc] sm:$0xf] }
 0xe2e   :  { %v1832_v8 = vpop.f32.mrb[66].mxu0 }
 0xe2f   :  { %v1900_v9 = vsel %vm249_vm2, %v1895_v6, 0  ;;  %v3133_v10 = vpop.f32.mrb[67].mxu0 }
 0xe30   :  { %3141 = vmatpush3.bf16.msra.mxu0 %v1900_v9 }
 0xe31   :  { %3152 = vmatprep.subr.bf16.mxu0 %v3315_v1 }
 0xe32   :  { %v3282_v11 = vpop.eup %3281 }
 0xe33   :  { %v1893_v12 = vmul.f32 %v3282_v11, %v3280_v60 }
 0xe35   :  { %v1894_v13 = vpack.c.bf16 %v1893_v12, %v1893_v12 }
 0xe37   :  { %3143 = vmatmul.mubr.msk.bf16.vlgmr.msra.gmra.mrb[68].mxu0 %vm245_vm3, %v1894_v13 }
 0xe38   :  { %3156 = vmatprep.mubr.msk.bf16.mxu0 %vm3316_vm0, %v3315_v1  ;;  %3153 = vmatpush3.bf16.msra.mxu0 %v3255_v23 }
 0xe39   :  { %3154 = vmatprep.subr.bf16.mxu0 %v3315_v1 }
 0xe3c   :  { %3155 = vmatpush3.bf16.msra.mxu0 %v3256_v25 }
 0xe3d   :  { %3168 = vmatprep.subr.bf16.mxu0 %v3315_v1 }
 0xe3f   :  { %3157 = vmatmul.mubr.msk.bf16.vlgmr.msra.gmra.mrb[72].mxu0 %vm77_vm1, %v3399_v5 }
 0xe40   :  { %3172 = vmatprep.mubr.msk.bf16.mxu0 %vm3316_vm0, %v3315_v1  ;;  %3169 = vmatpush3.bf16.msra.mxu0 %v3257_v45 }
 0xe41   :  { %3170 = vmatprep.subr.bf16.mxu0 %v3315_v1 }
 0xe44   :  { %3171 = vmatpush3.bf16.msra.mxu0 %v3258_v46 }
 0xe45   :  { %3182 = vmatprep.subr.bf16.mxu0 %v3315_v1 }
 0xe47   :  { %3173 = vmatmul.mubr.msk.bf16.vlgmr.msra.gmra.mrb[76].mxu0 %vm77_vm1, %v3399_v5 }
 0xe48   :  { %3184 = vmatprep.mubr.msk.bf16.mxu0 %vm3316_vm0, %v3315_v1 }
 0xf0a   :  { %v1936_v16 = vpop.f32.mrb[68].mxu0 }
 0xf0b   :  { %v1942_v18 = vpack.c.bf16 %v1936_v16, %v1740_v62  ;;  %v3144_v19 = vpop.f32.mrb[69].mxu0 }
 0xf0c   :  { %v1939_v20 = vpop.f32.mrb[70].mxu0 }
 0xf0d   :  { %v3145_v21 = vpop.f32.mrb[71].mxu0  ;;  %3149 = vmatmul.mubr.msk.bf16.vlgmr.msra.gmra.mrb[68].mxu1 %vm245_vm3, %v1942_v18 }
 0xf0e   :  { %3161 = vmatpush3.bf16.msra.mxu1 %v3253_v17  ;;  %3164 = vmatprep.mubr.msk.bf16.mxu1 %vm3316_vm0, %v3315_v1 }
 0xf0f   :  { %3162 = vmatprep.subr.bf16.mxu1 %v3315_v1 }
 0xf12   :  { %3163 = vmatpush3.bf16.msra.mxu1 %v3254_v22  ;;  %v2067_v38 = vpop.f32.mrb[72].mxu0 }
 0xf13   :  { %3176 = vmatprep.subr.bf16.mxu1 %v3315_v1  ;;  %v3158_v39 = vpop.f32.mrb[73].mxu0  ;;  %v2068_v55 = vadd.f32 %v2786_v37, %v2067_v38 }
 0xf14   :  { %v2070_v40 = vpop.f32.mrb[74].mxu0 }
 0xf15   :  { %3165 = vmatmul.mubr.msk.bf16.vlgmr.msra.gmra.mrb[72].mxu1 %vm77_vm1, %v3399_v5  ;;  %v2071_v41 = vadd.f32 %v2786_v37, %v2070_v40  ;;  %v3159_v42 = vpop.f32.mrb[75].mxu0  ;;  %v2196_v57 = vpack.c.bf16 %v2068_v55, %v2068_v55  ;;  %v2796_v5 = vld [vmem:[%s3844_s6 + $0x3] ss:$0 sm:$0xff] }
 0xf16   :  { %3178 = vmatprep.mubr.msk.bf16.mxu1 %vm3316_vm0, %v3315_v1 }
 0xf17   :  { %v2398_v18 = vpack.c.bf16 %v2071_v41, %v2071_v41 }
 0xf1a   :  { %v2189_v59 = vpop.f32.mrb[76].mxu0 }
 0xf1b   :  { %v2190_v60 = vadd.f32 %v2796_v5, %v2189_v59  ;;  %v3174_v61 = vpop.f32.mrb[77].mxu0 }
 0xf1c   :  { %v2192_v62 = vpop.f32.mrb[78].mxu0  ;;  %v2782_v61 = vld [vmem:[%s3847_s9 + $0xc] sm:$0xf]  ;;  %s3317_s9 = smov [#allocation2]  }
 0xf1d   :  { %v2198_v63 = vpack.c.bf16 %v2190_v60, %v2190_v60  ;;  %v2193_v0 = vadd.f32 %v2796_v5, %v2192_v62  ;;  %v3175_v2 = vpop.f32.mrb[79].mxu0  ;;  %v2599_v62 = vsel %vm249_vm2, %v2782_v61, 0  ;;  %s2660_s30 = sshll.u32 %s3317_s9, 4  ;;  %s2661_s30 = int_to_ptr.vmem [resolvable:$true] %s2660_s30 }
 0xf1e   :  { %s3291_s12 = scalar_lea.vmem %s2661_s30, 256  ;;  %p3296_p1 = scmp.lt.s32.totalorder %s2661_s30, %s2661_s30 }
 0xf1f   :  { %v2249_v3 = vsel %vm249_vm2, %v2198_v63, 0  ;;  %p3292_p0 = scmp.ne.s32.totalorder %s2661_s30, %s3291_s12  ;;  %p3297_p2 = scmp.lt.s32.totalorder %s3291_s12, %s3291_s12 }
 0xf20   :  { %3183 = vmatpush3.bf16.msra.mxu0 %v2249_v3 }
 0xf21   :  { %3194 = vmatprep.subr.bf16.mxu0 %v3315_v1  ;;  %p3298_p3 = por %p3297_p2, %p3296_p1 }
 0xf23   :  { %3185 = vmatmul.mubr.msk.bf16.vlgmr.msra.gmra.mrb[80].mxu0 %vm245_vm3, %v2784_v4  ;;  %p3299_p4 = pnand %p3298_p3, %p3292_p0 }
 0xf24   :  { %3196 = vmatprep.mubr.msk.bf16.mxu0 %vm3316_vm0, %v3315_v1 }
 0xfe0   :  { %v1983_v43 = vpop.f32.mrb[68].mxu1 }
 0xfe1   :  { %v3741_v44 = vadd.f32 %v1983_v43, %v3656_v50  ;;  %v3150_v24 = vpop.f32.mrb[69].mxu1 }
 0xfe2   :  { %v1986_v26 = vpop.f32.mrb[70].mxu1 }
 0xfe3   :  { %v3744_v27 = vadd.f32 %v1986_v26, %v3658_v53  ;;  %v3151_v28 = vpop.f32.mrb[71].mxu1  ;;  %v2783_v53 = vld [vmem:[%s3845_s7 + $0xc] sm:$0xf] }
 0xfe8   :  { %v2128_v30 = vpop.f32.mrb[72].mxu1 }
 0xfe9   :  { %v2129_v31 = vadd.f32 %v2791_v29, %v2128_v30  ;;  %v3166_v32 = vpop.f32.mrb[73].mxu1 }
 0xfea   :  { %v2131_v33 = vpop.f32.mrb[74].mxu1 }
 0xfeb   :  { %v2197_v34 = vpack.c.bf16 %v2129_v31, %v2129_v31  ;;  %v2132_v35 = vadd.f32 %v2791_v29, %v2131_v33  ;;  %v3167_v36 = vpop.f32.mrb[75].mxu1 }
 0xfed   :  { %v2203_v50 = vsel %vm249_vm2, %v2197_v34, 0  ;;  %v2399_v56 = vpack.c.bf16 %v2132_v35, %v2132_v35 }
 0xfee   :  { %3177 = vmatpush3.bf16.msra.mxu1 %v2203_v50 }
 0xfef   :  { %3188 = vmatprep.subr.bf16.mxu1 %v3315_v1  ;;  %v2402_v58 = vsel %vm249_vm2, %v2399_v56, 0 }
 0xff1   :  { %3179 = vmatmul.mubr.msk.bf16.vlgmr.msra.gmra.mrb[76].mxu1 %vm245_vm3, %v2783_v53 }
 0xff2   :  { %3190 = vmatprep.mubr.msk.bf16.mxu1 %vm3316_vm0, %v3315_v1 }
 0xff6   :  { %v2285_v25 = vpop.f32.mrb[80].mxu0 }
 0xff7   :  { %v2351_v43 = vpack.c.bf16 %v2285_v25, %v2285_v25  ;;  %v3186_v24 = vpop.f32.mrb[81].mxu0 }
 0xff8   :  { %v2288_v26 = vpop.f32.mrb[82].mxu0 }
 0xff9   :  { %v2356_v28 = vsel %vm249_vm2, %v2351_v43, 0  ;;  %v3187_v29 = vpop.f32.mrb[83].mxu0 }
 0xffa   :  { %3195 = vmatpush3.bf16.msra.mxu0 %v2356_v28 }
 0xffb   :  { %3206 = vmatprep.subr.bf16.mxu0 %v3315_v1 }
0x10c4   :  { %v2239_v47 = vpop.f32.mrb[76].mxu1 }
0x10c5   :  { %v2291_v48 = vpack.c.bf16 %v2239_v47, %v2239_v47  ;;  %v3180_v49 = vpop.f32.mrb[77].mxu1 }
0x10c6   :  { %v2242_v51 = vpop.f32.mrb[78].mxu1 }
0x10c7   :  { %v2296_v52 = vsel %vm245_vm3, %v2291_v48, 0  ;;  %v3181_v54 = vpop.f32.mrb[79].mxu1 }
0x10c8   :  { %3189 = vmatpush3.bf16.xpose.msra.mxu1 %v2296_v52 }
0x10c9   :  { %3200 = vmatprep.subr.bf16.mxu1 %v3315_v1 }
0x10cf   :  { %3191 = vmatmul.mubr.msk.bf16.vlgmr.msra.gmra.mrb[80].mxu1 %vm245_vm3, %v2196_v57 }
0x10d0   :  { %3201 = vmatpush3.bf16.msra.mxu1 %v2402_v58  ;;  %3202 = vmatprep.mubr.msk.bf16.mxu1 %vm3316_vm0, %v3315_v1 }
0x10d1   :  { %3212 = vmatprep.subr.bf16.mxu1 %v3315_v1 }
0x10d7   :  { %3203 = vmatmul.mubr.msk.bf16.vlgmr.msra.gmra.mrb[84].mxu1 %vm245_vm3, %v2783_v53  ;;  %v2400_v53 = vpack.c.bf16 %v2193_v0, %v2193_v0 }
0x10d8   :  { %3214 = vmatprep.mubr.msk.bf16.mxu1 %vm3316_vm0, %v3315_v1 }
0x10d9   :  { %v2445_v39 = vsel %vm249_vm2, %v2400_v53, 0 }
0x11a2   :  { %v2332_v6 = vpop.f32.mrb[80].mxu1 }
0x11a3   :  { %v2338_v7 = vmul.f32 0.35355338, %v2332_v6  ;;  %v3192_v8 = vpop.f32.mrb[81].mxu1 }
0x11a4   :  { %v2335_v9 = vpop.f32.mrb[82].mxu1 }
0x11a5   :  { %v2339_v10 = vsel %vm245_vm3, %v2338_v7, -inf  ;;  %v3193_v11 = vpop.f32.mrb[83].mxu1 }
0x11a6   :  { %2340 = vmax.xlane.f32.xlu0 %v2339_v10 }
0x11aa   :  { %v2438_v12 = vpop.f32.mrb[84].mxu1 }
0x11ab   :  { %v2487_v13 = vpack.c.bf16 %v2438_v12, %v2438_v12  ;;  %v3204_v14 = vpop.f32.mrb[85].mxu1 }
0x11ac   :  { %v2441_v15 = vpop.f32.mrb[86].mxu1 }
0x11ad   :  { %v2492_v16 = vsel %vm245_vm3, %v2487_v13, 0  ;;  %v3205_v17 = vpop.f32.mrb[87].mxu1 }
0x11ae   :  { %3213 = vmatpush3.bf16.xpose.msra.mxu1 %v2492_v16 }
0x11af   :  { %3224 = vmatprep.subr.bf16.mxu1 %v3315_v1 }
0x11b5   :  { %3215 = vmatmul.mubr.msk.bf16.vlgmr.msra.gmra.mrb[88].mxu1 %vm245_vm3, %v2398_v18 }
0x11b6   :  { %3226 = vmatprep.mubr.msk.bf16.mxu1 %vm3316_vm0, %v3315_v1  ;;  %3225 = vmatpush3.bf16.msra.mxu1 %v2599_v62 }
0x1233   :  { %v2341_v19 = vpop.xlane.xlu0 %2340 }
0x1234   :  { %v2342_v20 = vsub.f32 %v2338_v7, %v2341_v19  ;;  %v2809_v7 = vld [vmem:[%s3848_s10] ss:$0 sm:$0xff] }
0x1236   :  { %v2343_v21 = vmul.f32 1.442695, %v2342_v20 }
0x1238   :  { %3283 = vpow2.f32 %v2343_v21 }
0x1242   :  { %v3284_v22 = vpop.eup %3283 }
0x1243   :  { %v2345_v23 = vsel %vm245_vm3, %v3284_v22, 0.0 }
0x1244   :  { %2346 = vadd.xlane.f32.xlu1 %v2345_v23 }
0x1288   :  { %v2528_v30 = vpop.f32.mrb[88].mxu1 }
0x1289   :  { %v2534_v31 = vmul.f32 0.35355338, %v2528_v30  ;;  %v3216_v32 = vpop.f32.mrb[89].mxu1 }
0x128a   :  { %v2531_v33 = vpop.f32.mrb[90].mxu1 }
0x128b   :  { %v3217_v34 = vpop.f32.mrb[91].mxu1  ;;  %v2535_v35 = vsel %vm245_vm3, %v2534_v31, -inf }
0x128c   :  { %2536 = vmax.xlane.f32.xlu0 %v2535_v35 }
0x12d1   :  { %v2347_v36 = vpop.xlane.xlu1 %2346 }
0x12d2   :  { %3285 = vrcp.f32 %v2347_v36 }
0x12dc   :  { %v3286_v50 = vpop.eup %3285 }
0x12dd   :  { %v2349_v37 = vmul.f32 %v3286_v50, %v3284_v22 }
0x12df   :  { %v2350_v38 = vpack.c.bf16 %v2349_v37, %v2349_v37 }
0x12e1   :  { %3197 = vmatmul.mubr.msk.bf16.vlgmr.msra.gmra.mrb[84].mxu0 %vm245_vm3, %v2350_v38 }
0x12e2   :  { %3207 = vmatpush3.bf16.msra.mxu0 %v2445_v39  ;;  %3208 = vmatprep.mubr.msk.bf16.mxu0 %vm3316_vm0, %v3315_v1 }
0x12e3   :  { %3218 = vmatprep.subr.bf16.mxu0 %v3315_v1 }
0x12e9   :  { %3209 = vmatmul.mubr.msk.bf16.vlgmr.msra.gmra.mrb[88].mxu0 %vm245_vm3, %v2784_v4 }
0x12ea   :  { %3220 = vmatprep.mubr.msk.bf16.mxu0 %vm3316_vm0, %v3315_v1 }
0x1319   :  { %v2537_v40 = vpop.xlane.xlu0 %2536 }
0x131a   :  { %v2538_v41 = vsub.f32 %v2534_v31, %v2537_v40 }
0x131c   :  { %v2539_v42 = vmul.f32 1.442695, %v2538_v41 }
0x131e   :  { %3287 = vpow2.f32 %v2539_v42 }
0x1328   :  { %v3288_v45 = vpop.eup %3287 }
0x1329   :  { %v2541_v46 = vsel %vm245_vm3, %v3288_v45, 0.0 }
0x132a   :  { %2542 = vadd.xlane.f32.xlu1 %v2541_v46 }
0x13b4   :  { %v2392_v47 = vpop.f32.mrb[84].mxu0 }
0x13b5   :  { %v3198_v48 = vpop.f32.mrb[85].mxu0 }
0x13b6   :  { %v2395_v49 = vpop.f32.mrb[86].mxu0 }
0x13b7   :  { %v2543_v51 = vpop.xlane.xlu1 %2542  ;;  %v3199_v52 = vpop.f32.mrb[87].mxu0 }
0x13b8   :  { %3289 = vrcp.f32 %v2543_v51 }
0x13bc   :  { %v2481_v54 = vpop.f32.mrb[88].mxu0 }
0x13bd   :  { %v2547_v55 = vpack.c.bf16 %v2481_v54, %v2481_v54  ;;  %v3210_v56 = vpop.f32.mrb[89].mxu0 }
0x13be   :  { %v2484_v57 = vpop.f32.mrb[90].mxu0 }
0x13bf   :  { %v2552_v1 = vsel %vm249_vm2, %v2547_v55, 0  ;;  %v3211_v58 = vpop.f32.mrb[91].mxu0 }
0x13c0   :  { %3219 = vmatpush3.bf16.msra.mxu0 %v2552_v1 }
0x13c2   :  { %v3290_v5 = vpop.eup %3289 }
0x13c3   :  { %v2545_v59 = vmul.f32 %v3290_v5, %v3288_v45 }
0x13c5   :  { %v2546_v60 = vpack.c.bf16 %v2545_v59, %v2545_v59 }
0x13c7   :  { %3221 = vmatmul.mubr.msk.bf16.vlgmr.msra.gmra.mrb[92].mxu0 %vm245_vm3, %v2546_v60 }
0x149a   :  { %v2588_v63 = vpop.f32.mrb[92].mxu0 }
0x149b   :  { %v2594_v0 = vpack.c.bf16 %v2588_v63, %v2392_v47  ;;  %v3222_v2 = vpop.f32.mrb[93].mxu0 }
0x149c   :  { %v2591_v3 = vpop.f32.mrb[94].mxu0 }
0x149d   :  { %v3223_v4 = vpop.f32.mrb[95].mxu0  ;;  %3227 = vmatmul.mubr.msk.bf16.vlgmr.msra.gmra.mrb[92].mxu1 %vm245_vm3, %v2594_v0 }
0x1570   :  { %v2635_v6 = vpop.f32.mrb[92].mxu1 }
0x1571   :  { %v2642_v8 = vadd.f32 %v2635_v6, %v3741_v44  ;;  %v3228_v9 = vpop.f32.mrb[93].mxu1 }
0x1572   :  { %v2638_v10 = vpop.f32.mrb[94].mxu1 }
0x1573   :  { %v2651_v11 = vadd.f32 %v2809_v7, %v2642_v8  ;;  %v2643_v12 = vadd.f32 %v2638_v10, %v3744_v27  ;;  %v3229_v13 = vpop.f32.mrb[95].mxu1 }
0x1575   :  { %2653 = vst.msk [vmem:[#allocation2] sm:$0xff] %vm77_vm1, %v2651_v11  ;;  %v2652_v14 = vadd.f32 %v2809_v7, %v2643_v12 }
0x1577   :  { %2654 = vst.msk [vmem:[#allocation2 + $0x8] sm:$0xff] %vm77_vm1, %v2652_v14 }
0x1578   :  { %3302 = shalt.err (!%p3299_p4)
}
0x1579   :  { %s3303_s14 = scalar_lea.hbm %s3849_s11, 256 }
0x157a   :  { %p3304_p5 = scmp.ne.s32.totalorder %s3849_s11, %s3303_s14  ;;  %p3307_p6 = scmp.lt.u32.totalorder %s3303_s14, %s3849_s11 }
0x157c   :  { %p3309_p7 = pnand %p3307_p6, %p3304_p5 }
0x157e   :  { %3312 = shalt.err (!%p3309_p7)
}
0x157f   :  { %s3318_s3 = smov 128   ;;  %s3319_s19 = smov 8  }
0x1580   :  { %2666 = dma.vmem_to_hbm [thread:$0]  %s2661_s30, 256, %s3849_s11, [#allocation3], %s3318_s3, %s3318_s3, %s3319_s19  }
0x1581   :  { %3313 = dma.done.wait [#allocation3], 256  }
0x1582   :  { %3314 = vsyncadd [#allocation3], 4294967040 }
0x1583   :  { %2670 = vsyncpa [#allocation3], 1 }

</bundles_post_ra>
